<compile_context>
chip_gen: v5e
topology: v5e:2x2
jax: 0.10.0
libtpu: 0.0.40
codegen_flags: <defaults>
</compile_context>

<pallas_src>
import math
import jax
import jax.numpy as jnp
from jax.experimental import pallas as pl
from jax.experimental.pallas import tpu as pltpu

# ---------------- model config (small, consistent with the module) -------------
VOCAB = 100
HIDDEN = 32
NUM_LAYERS = 2
NUM_HEADS = 4
HEAD_DIM = HIDDEN // NUM_HEADS
INTERMEDIATE = 64
MAX_POS = 32
NUM_LABELS = 7
LN_EPS = 1e-12
ATT_SCALE = 1.0 / math.sqrt(HEAD_DIM)


# ---------------- small helpers -------------------------------------------------
def _layer_norm(x, g, b, eps=LN_EPS):
    mu = jnp.mean(x, axis=-1, keepdims=True)
    var = jnp.mean((x - mu) ** 2, axis=-1, keepdims=True)
    return (x - mu) * jax.lax.rsqrt(var + eps) * g + b


def _gelu(y):
    # TODO(synk): HF BERT uses exact erf-GELU; tanh approximation used here.
    return 0.5 * y * (1.0 + jnp.tanh(0.7978845608028654 * (y + 0.044715 * y * y * y)))


def _resident(shape):
    """Whole-array BlockSpec whose block index is constant across the batch grid,
    so the operand is DMA'd into VMEM once and stays resident."""
    zeros = (0,) * len(shape)
    return pl.BlockSpec(shape, lambda b: zeros)


# ---------------- fused encoder kernel ------------------------------------------
def encoder_fused(emb, add_mask, params):
    """emb: (B*S, H) f32 pre-LN embeddings; add_mask: (B, 1, S) additive mask.

    Returns logits (B, NUM_LABELS)."""
    BS, H = emb.shape
    B = add_mask.shape[0]
    S = BS // B
    NH, DH, L, I = NUM_HEADS, HEAD_DIM, NUM_LAYERS, INTERMEDIATE

    def kernel(emb_ref, mask_ref,
               emb_g_ref, emb_b_ref,
               qkv_w_ref, qkv_b_ref,
               ao_w_ref, ao_b_ref,
               ln1_g_ref, ln1_b_ref,
               i_w_ref, i_b_ref,
               o2_w_ref, o2_b_ref,
               ln2_g_ref, ln2_b_ref,
               pool_w_ref, pool_b_ref,
               cls_w_ref, cls_b_ref,
               out_ref):
        m = mask_ref[...]                                       # (1, 1, S) additive mask
        # ---- embedding LayerNorm (f32) ----
        h = _layer_norm(emb_ref[...], emb_g_ref[...], emb_b_ref[...])     # (S, H)

        # ---- transformer layers (unrolled; weights resident in VMEM) ----
        for l in range(L):
            # fused QKV projection: one (S,H)x(H,3H) bf16 matmul, f32 accumulation.
            # 1/sqrt(head_dim) is pre-folded into the Q columns of qkv_w.
            qkv = (jnp.dot(h.astype(jnp.bfloat16), qkv_w_ref[l],
                           preferred_element_type=jnp.float32) + qkv_b_ref[l])   # (S,3H)

            def heads(x0):  # (S, H) -> (NH, S, DH), kept in registers
                return jnp.stack([x0[:, n * DH:(n + 1) * DH] for n in range(NH)], axis=0)

            q = heads(qkv[:, 0 * H:1 * H]).astype(jnp.bfloat16)
            k = heads(qkv[:, 1 * H:2 * H]).astype(jnp.bfloat16)
            v = heads(qkv[:, 2 * H:3 * H]).astype(jnp.bfloat16)

            # head-batched attention: two batched contractions per layer
            s = jnp.einsum('hqd,hkd->hqk', q, k,
                           preferred_element_type=jnp.float32) + m        # (NH,S,S) f32
            s = s - jnp.max(s, axis=-1, keepdims=True)
            p = jnp.exp(s)
            p = p * pl.reciprocal(jnp.sum(p, axis=-1, keepdims=True))     # exact recip
            ctx3 = jnp.einsum('hqk,hkd->hqd', p.astype(jnp.bfloat16), v,
                              preferred_element_type=jnp.float32)         # (NH,S,DH)
            # merge heads along the lane dim, no VMEM scratch round-trip
            ctx = jnp.concatenate([ctx3[n] for n in range(NH)], axis=1)   # (S,H) f32

            # output projection + residual + LayerNorm (matmul epilogue)
            attn_out = (jnp.dot(ctx.astype(jnp.bfloat16), ao_w_ref[l],
                                preferred_element_type=jnp.float32) + ao_b_ref[l])
            h = _layer_norm(attn_out + h, ln1_g_ref[l], ln1_b_ref[l])

            # FFN + residual + LayerNorm
            ffn = _gelu(jnp.dot(h.astype(jnp.bfloat16), i_w_ref[l],
                                preferred_element_type=jnp.float32) + i_b_ref[l])
            ffn_out = (jnp.dot(ffn.astype(jnp.bfloat16), o2_w_ref[l],
                               preferred_element_type=jnp.float32) + o2_b_ref[l])
            h = _layer_norm(ffn_out + h, ln2_g_ref[l], ln2_b_ref[l])

        # ---- pooler (tanh) + dropout(identity) + classifier, CLS row only ----
        cls_row = h[0:1, :]                                               # (1, H)
        pooled = jnp.tanh(jnp.dot(cls_row.astype(jnp.bfloat16), pool_w_ref[...],
                                  preferred_element_type=jnp.float32) + pool_b_ref[...])
        logits = (jnp.dot(pooled.astype(jnp.bfloat16), cls_w_ref[...],
                          preferred_element_type=jnp.float32) + cls_b_ref[...])   # (1,NL)
        out_ref[...] = logits.reshape(1, 1, NUM_LABELS)

    inputs = (
        emb, add_mask,
        params["emb_ln_g"].reshape(1, H), params["emb_ln_b"].reshape(1, H),
        params["qkv_w"], params["qkv_b"].reshape(L, 1, 3 * H),
        params["o_w"], params["o_b"].reshape(L, 1, H),
        params["ln1_g"].reshape(L, 1, H), params["ln1_b"].reshape(L, 1, H),
        params["i_w"], params["i_b"].reshape(L, 1, I),
        params["o2_w"], params["o2_b"].reshape(L, 1, H),
        params["ln2_g"].reshape(L, 1, H), params["ln2_b"].reshape(L, 1, H),
        params["pool_w"], params["pool_b"].reshape(1, H),
        params["cls_w"], params["cls_b"].reshape(1, NUM_LABELS),
    )

    in_specs = [
        pl.BlockSpec((S, H), lambda b: (b, 0)),          # per-batch embedding rows
        pl.BlockSpec((1, 1, S), lambda b: (b, 0, 0)),    # per-batch additive mask
    ] + [_resident(a.shape) for a in inputs[2:]]

    # NOTE: pipeline_mode=pl.Buffered(1) on the resident weight specs would halve their
    # VMEM footprint; irrelevant at this toy size so kept at the default.
    out = pl.pallas_call(
        kernel,
        out_shape=jax.ShapeDtypeStruct((B, 1, NUM_LABELS), jnp.float32),
        grid=(B,),
        in_specs=in_specs,
        out_specs=pl.BlockSpec((1, 1, NUM_LABELS), lambda b: (b, 0, 0)),
        compiler_params=pltpu.CompilerParams(dimension_semantics=("parallel",)),
    )(*inputs)
    return out.reshape(B, NUM_LABELS)


# ---------------- parameter construction (deterministic, stacked per layer) -----
def init_params(key):
    def nrm(k, shape):
        return 0.02 * jax.random.normal(k, shape, dtype=jnp.float32)

    keys = jax.random.split(key, 5 + NUM_LAYERS)
    p = {
        "word_emb": nrm(keys[0], (VOCAB, HIDDEN)),
        "pos_emb": nrm(keys[1], (MAX_POS, HIDDEN)),
        "tok_emb": nrm(keys[2], (2, HIDDEN)),
        "emb_ln_g": jnp.ones((HIDDEN,), jnp.float32),
        "emb_ln_b": jnp.zeros((HIDDEN,), jnp.float32),
        # matmul weights stored bf16 (MXU-native); accumulation stays f32 in-kernel
        "pool_w": nrm(keys[3], (HIDDEN, HIDDEN)).astype(jnp.bfloat16),
        "pool_b": jnp.zeros((HIDDEN,), jnp.float32),
        "cls_w": nrm(keys[4], (HIDDEN, NUM_LABELS)).astype(jnp.bfloat16),
        "cls_b": jnp.zeros((NUM_LABELS,), jnp.float32),
    }

    qkv_w, o_w, i_w, o2_w = [], [], [], []
    for l in range(NUM_LAYERS):
        lk = jax.random.split(keys[5 + l], 6)
        # fused QKV weight (H, 3H); 1/sqrt(head_dim) folded into the Q columns
        # (Q bias is zero, so no bias scaling is needed).
        qkv_w.append(jnp.concatenate(
            [nrm(lk[0], (HIDDEN, HIDDEN)) * ATT_SCALE,
             nrm(lk[1], (HIDDEN, HIDDEN)),
             nrm(lk[2], (HIDDEN, HIDDEN))], axis=1))
        o_w.append(nrm(lk[3], (HIDDEN, HIDDEN)))
        i_w.append(nrm(lk[4], (HIDDEN, INTERMEDIATE)))
        o2_w.append(nrm(lk[5], (INTERMEDIATE, HIDDEN)))

    L = NUM_LAYERS
    p.update({
        "qkv_w": jnp.stack(qkv_w).astype(jnp.bfloat16),          # (L, H, 3H)
        "qkv_b": jnp.zeros((L, 3 * HIDDEN), jnp.float32),
        "o_w": jnp.stack(o_w).astype(jnp.bfloat16),              # (L, H, H)
        "o_b": jnp.zeros((L, HIDDEN), jnp.float32),
        "ln1_g": jnp.ones((L, HIDDEN), jnp.float32),
        "ln1_b": jnp.zeros((L, HIDDEN), jnp.float32),
        "i_w": jnp.stack(i_w).astype(jnp.bfloat16),              # (L, H, I)
        "i_b": jnp.zeros((L, INTERMEDIATE), jnp.float32),
        "o2_w": jnp.stack(o2_w).astype(jnp.bfloat16),            # (L, I, H)
        "o2_b": jnp.zeros((L, HIDDEN), jnp.float32),
        "ln2_g": jnp.ones((L, HIDDEN), jnp.float32),
        "ln2_b": jnp.zeros((L, HIDDEN), jnp.float32),
    })
    return p


# ---------------- forward pass ---------------------------------------------------
def text_encoder_forward(params, input_ids, attention_mask):
    B, S = input_ids.shape
    H = HIDDEN

    # Embedding lookups (gathers = XLA glue); everything downstream is one Pallas kernel.
    word = params["word_emb"][input_ids]                  # (B, S, H)
    pos = params["pos_emb"][:S][None, :, :]               # (1, S, H)
    tok = params["tok_emb"][0][None, None, :]             # token_type_ids = 0
    emb = (word + pos + tok).astype(jnp.float32).reshape(B * S, H)

    # Additive attention mask: 0 for keep, -10000 for masked; shaped (B, 1, S)
    add_mask = ((1.0 - attention_mask.astype(jnp.float32)) * -10000.0).reshape(B, 1, S)

    # Dropout(p=0.3) before the classifier is identity at inference time.
    return encoder_fused(emb, add_mask, params)


# ---------------- main -----------------------------------------------------------
if __name__ == "__main__":
    key = jax.random.PRNGKey(0)
    pkey, ikey = jax.random.split(key)

    params = init_params(pkey)

    B, S = 2, 8
    input_ids = jax.random.randint(ikey, (B, S), 0, VOCAB, dtype=jnp.int32)
    attention_mask = jnp.array(
        [[1, 1, 1, 1, 1, 1, 1, 1],
         [1, 1, 1, 1, 1, 1, 0, 0]], dtype=jnp.int32)

    logits = text_encoder_forward(params, input_ids, attention_mask)
    logits = jax.block_until_ready(logits)

    assert logits.shape == (B, NUM_LABELS)
    assert bool(jnp.all(jnp.isfinite(logits)))
    print("KERNEL_OK")
</pallas_src>

<mosaic_0001>
module attributes {stable_mosaic.version = 11 : i64} {
  func.func @kernel(%arg0: i32, %arg1: memref<8x32xf32, #tpu.memory_space<vmem>>, %arg2: memref<1x1x8xf32, #tpu.memory_space<vmem>>, %arg3: memref<1x32xf32, #tpu.memory_space<vmem>>, %arg4: memref<1x32xf32, #tpu.memory_space<vmem>>, %arg5: memref<2x32x96xbf16, #tpu.memory_space<vmem>>, %arg6: memref<2x1x96xf32, #tpu.memory_space<vmem>>, %arg7: memref<2x32x32xbf16, #tpu.memory_space<vmem>>, %arg8: memref<2x1x32xf32, #tpu.memory_space<vmem>>, %arg9: memref<2x1x32xf32, #tpu.memory_space<vmem>>, %arg10: memref<2x1x32xf32, #tpu.memory_space<vmem>>, %arg11: memref<2x32x64xbf16, #tpu.memory_space<vmem>>, %arg12: memref<2x1x64xf32, #tpu.memory_space<vmem>>, %arg13: memref<2x64x32xbf16, #tpu.memory_space<vmem>>, %arg14: memref<2x1x32xf32, #tpu.memory_space<vmem>>, %arg15: memref<2x1x32xf32, #tpu.memory_space<vmem>>, %arg16: memref<2x1x32xf32, #tpu.memory_space<vmem>>, %arg17: memref<32x32xbf16, #tpu.memory_space<vmem>>, %arg18: memref<1x32xf32, #tpu.memory_space<vmem>>, %arg19: memref<32x7xbf16, #tpu.memory_space<vmem>>, %arg20: memref<1x7xf32, #tpu.memory_space<vmem>>, %arg21: memref<1x1x7xf32, #tpu.memory_space<vmem>>) attributes {dimension_semantics = [#tpu.dimension_semantics<parallel>], iteration_bounds = array<i64: 2>, scalar_prefetch = 0 : i64, scratch_operands = 0 : i64, tpu.core_type = #tpu.core_type<tc>, window_params = [{transform_indices = @transform_0, window_bounds = array<i64: 8, 32>}, {transform_indices = @transform_1, window_bounds = array<i64: 1, 1, 8>}, {pipeline_mode = #tpu.pipeline_mode<synchronous>, transform_indices = @transform_2, window_bounds = array<i64: 1, 32>}, {pipeline_mode = #tpu.pipeline_mode<synchronous>, transform_indices = @transform_3, window_bounds = array<i64: 1, 32>}, {pipeline_mode = #tpu.pipeline_mode<synchronous>, transform_indices = @transform_4, window_bounds = array<i64: 2, 32, 96>}, {pipeline_mode = #tpu.pipeline_mode<synchronous>, transform_indices = @transform_5, window_bounds = array<i64: 2, 1, 96>}, {pipeline_mode = #tpu.pipeline_mode<synchronous>, transform_indices = @transform_6, window_bounds = array<i64: 2, 32, 32>}, {pipeline_mode = #tpu.pipeline_mode<synchronous>, transform_indices = @transform_7, window_bounds = array<i64: 2, 1, 32>}, {pipeline_mode = #tpu.pipeline_mode<synchronous>, transform_indices = @transform_8, window_bounds = array<i64: 2, 1, 32>}, {pipeline_mode = #tpu.pipeline_mode<synchronous>, transform_indices = @transform_9, window_bounds = array<i64: 2, 1, 32>}, {pipeline_mode = #tpu.pipeline_mode<synchronous>, transform_indices = @transform_10, window_bounds = array<i64: 2, 32, 64>}, {pipeline_mode = #tpu.pipeline_mode<synchronous>, transform_indices = @transform_11, window_bounds = array<i64: 2, 1, 64>}, {pipeline_mode = #tpu.pipeline_mode<synchronous>, transform_indices = @transform_12, window_bounds = array<i64: 2, 64, 32>}, {pipeline_mode = #tpu.pipeline_mode<synchronous>, transform_indices = @transform_13, window_bounds = array<i64: 2, 1, 32>}, {pipeline_mode = #tpu.pipeline_mode<synchronous>, transform_indices = @transform_14, window_bounds = array<i64: 2, 1, 32>}, {pipeline_mode = #tpu.pipeline_mode<synchronous>, transform_indices = @transform_15, window_bounds = array<i64: 2, 1, 32>}, {pipeline_mode = #tpu.pipeline_mode<synchronous>, transform_indices = @transform_16, window_bounds = array<i64: 32, 32>}, {pipeline_mode = #tpu.pipeline_mode<synchronous>, transform_indices = @transform_17, window_bounds = array<i64: 1, 32>}, {pipeline_mode = #tpu.pipeline_mode<synchronous>, transform_indices = @transform_18, window_bounds = array<i64: 32, 7>}, {pipeline_mode = #tpu.pipeline_mode<synchronous>, transform_indices = @transform_19, window_bounds = array<i64: 1, 7>}, {transform_indices = @transform_20, window_bounds = array<i64: 1, 1, 7>}]} {
    %c0 = arith.constant 0 : index
    %c0_0 = arith.constant 0 : index
    %c0_1 = arith.constant 0 : index
    %0 = vector.load %arg2[%c0, %c0_0, %c0_1] : memref<1x1x8xf32, #tpu.memory_space<vmem>>, vector<1x1x8xf32>
    %c0_2 = arith.constant 0 : index
    %c0_3 = arith.constant 0 : index
    %1 = vector.load %arg1[%c0_2, %c0_3] : memref<8x32xf32, #tpu.memory_space<vmem>>, vector<8x32xf32>
    %c0_4 = arith.constant 0 : index
    %c0_5 = arith.constant 0 : index
    %2 = vector.load %arg3[%c0_4, %c0_5] : memref<1x32xf32, #tpu.memory_space<vmem>>, vector<1x32xf32>
    %c0_6 = arith.constant 0 : index
    %c0_7 = arith.constant 0 : index
    %3 = vector.load %arg4[%c0_6, %c0_7] : memref<1x32xf32, #tpu.memory_space<vmem>>, vector<1x32xf32>
    %cst = arith.constant dense<0.000000e+00> : vector<8xf32>
    %4 = vector.multi_reduction <add>, %1, %cst [1] : vector<8x32xf32> to vector<8xf32>
    %5 = vector.shape_cast %4 : vector<8xf32> to vector<8x1xf32>
    %cst_8 = arith.constant 3.200000e+01 : f32
    %6 = vector.broadcast %cst_8 : f32 to vector<8x1xf32>
    %7 = arith.divf %5, %6 : vector<8x1xf32>
    %8 = vector.broadcast %7 : vector<8x1xf32> to vector<8x32xf32>
    %9 = arith.subf %1, %8 : vector<8x32xf32>
    %10 = arith.mulf %9, %9 : vector<8x32xf32>
    %cst_9 = arith.constant dense<0.000000e+00> : vector<8xf32>
    %11 = vector.multi_reduction <add>, %10, %cst_9 [1] : vector<8x32xf32> to vector<8xf32>
    %12 = vector.shape_cast %11 : vector<8xf32> to vector<8x1xf32>
    %cst_10 = arith.constant 3.200000e+01 : f32
    %13 = vector.broadcast %cst_10 : f32 to vector<8x1xf32>
    %14 = arith.divf %12, %13 : vector<8x1xf32>
    %15 = vector.broadcast %7 : vector<8x1xf32> to vector<8x32xf32>
    %16 = arith.subf %1, %15 : vector<8x32xf32>
    %cst_11 = arith.constant 9.99999996E-13 : f32
    %17 = vector.broadcast %cst_11 : f32 to vector<8x1xf32>
    %18 = arith.addf %14, %17 : vector<8x1xf32>
    %19 = math.rsqrt %18 : vector<8x1xf32>
    %20 = vector.broadcast %19 : vector<8x1xf32> to vector<8x32xf32>
    %21 = arith.mulf %16, %20 : vector<8x32xf32>
    %22 = vector.broadcast %2 : vector<1x32xf32> to vector<8x32xf32>
    %23 = arith.mulf %21, %22 : vector<8x32xf32>
    %24 = vector.broadcast %3 : vector<1x32xf32> to vector<8x32xf32>
    %25 = arith.addf %23, %24 : vector<8x32xf32>
    %26 = arith.truncf %25 : vector<8x32xf32> to vector<8x32xbf16>
    %c0_12 = arith.constant 0 : index
    %c0_13 = arith.constant 0 : index
    %c0_14 = arith.constant 0 : index
    %27 = vector.load %arg5[%c0_12, %c0_13, %c0_14] : memref<2x32x96xbf16, #tpu.memory_space<vmem>>, vector<1x32x96xbf16>
    %28 = vector.shape_cast %27 : vector<1x32x96xbf16> to vector<32x96xbf16>
    %cst_15 = arith.constant dense<0.000000e+00> : vector<8x96xf32>
    %29 = tpu.matmul %26, %28, %cst_15 {dimension_numbers = #tpu.dot_dimension_numbers<[1], [0], [0], [1], [0, 0, 1, 1], [], []>} : vector<8x32xbf16>, vector<32x96xbf16>, vector<8x96xf32> -> vector<8x96xf32>
    %c0_16 = arith.constant 0 : index
    %c0_17 = arith.constant 0 : index
    %c0_18 = arith.constant 0 : index
    %30 = vector.load %arg6[%c0_16, %c0_17, %c0_18] : memref<2x1x96xf32, #tpu.memory_space<vmem>>, vector<1x1x96xf32>
    %31 = vector.shape_cast %30 : vector<1x1x96xf32> to vector<1x96xf32>
    %32 = vector.broadcast %31 : vector<1x96xf32> to vector<8x96xf32>
    %33 = arith.addf %29, %32 : vector<8x96xf32>
    %34 = vector.extract_strided_slice %33 {offsets = [0, 0], sizes = [8, 32], strides = [1, 1]} : vector<8x96xf32> to vector<8x32xf32>
    %35 = vector.extract_strided_slice %34 {offsets = [0, 0], sizes = [8, 8], strides = [1, 1]} : vector<8x32xf32> to vector<8x8xf32>
    %36 = vector.extract_strided_slice %34 {offsets = [0, 8], sizes = [8, 8], strides = [1, 1]} : vector<8x32xf32> to vector<8x8xf32>
    %37 = vector.extract_strided_slice %34 {offsets = [0, 16], sizes = [8, 8], strides = [1, 1]} : vector<8x32xf32> to vector<8x8xf32>
    %38 = vector.extract_strided_slice %34 {offsets = [0, 24], sizes = [8, 8], strides = [1, 1]} : vector<8x32xf32> to vector<8x8xf32>
    %39 = vector.shape_cast %35 : vector<8x8xf32> to vector<1x8x8xf32>
    %40 = vector.shape_cast %36 : vector<8x8xf32> to vector<1x8x8xf32>
    %41 = vector.shape_cast %37 : vector<8x8xf32> to vector<1x8x8xf32>
    %42 = vector.shape_cast %38 : vector<8x8xf32> to vector<1x8x8xf32>
    %43 = tpu.concatenate %39, %40, %41, %42 in 0 : vector<1x8x8xf32>, vector<1x8x8xf32>, vector<1x8x8xf32>, vector<1x8x8xf32> -> vector<4x8x8xf32>
    %44 = arith.truncf %43 : vector<4x8x8xf32> to vector<4x8x8xbf16>
    %45 = vector.extract_strided_slice %33 {offsets = [0, 32], sizes = [8, 32], strides = [1, 1]} : vector<8x96xf32> to vector<8x32xf32>
    %46 = vector.extract_strided_slice %45 {offsets = [0, 0], sizes = [8, 8], strides = [1, 1]} : vector<8x32xf32> to vector<8x8xf32>
    %47 = vector.extract_strided_slice %45 {offsets = [0, 8], sizes = [8, 8], strides = [1, 1]} : vector<8x32xf32> to vector<8x8xf32>
    %48 = vector.extract_strided_slice %45 {offsets = [0, 16], sizes = [8, 8], strides = [1, 1]} : vector<8x32xf32> to vector<8x8xf32>
    %49 = vector.extract_strided_slice %45 {offsets = [0, 24], sizes = [8, 8], strides = [1, 1]} : vector<8x32xf32> to vector<8x8xf32>
    %50 = vector.shape_cast %46 : vector<8x8xf32> to vector<1x8x8xf32>
    %51 = vector.shape_cast %47 : vector<8x8xf32> to vector<1x8x8xf32>
    %52 = vector.shape_cast %48 : vector<8x8xf32> to vector<1x8x8xf32>
    %53 = vector.shape_cast %49 : vector<8x8xf32> to vector<1x8x8xf32>
    %54 = tpu.concatenate %50, %51, %52, %53 in 0 : vector<1x8x8xf32>, vector<1x8x8xf32>, vector<1x8x8xf32>, vector<1x8x8xf32> -> vector<4x8x8xf32>
    %55 = arith.truncf %54 : vector<4x8x8xf32> to vector<4x8x8xbf16>
    %56 = vector.extract_strided_slice %33 {offsets = [0, 64], sizes = [8, 32], strides = [1, 1]} : vector<8x96xf32> to vector<8x32xf32>
    %57 = vector.extract_strided_slice %56 {offsets = [0, 0], sizes = [8, 8], strides = [1, 1]} : vector<8x32xf32> to vector<8x8xf32>
    %58 = vector.extract_strided_slice %56 {offsets = [0, 8], sizes = [8, 8], strides = [1, 1]} : vector<8x32xf32> to vector<8x8xf32>
    %59 = vector.extract_strided_slice %56 {offsets = [0, 16], sizes = [8, 8], strides = [1, 1]} : vector<8x32xf32> to vector<8x8xf32>
    %60 = vector.extract_strided_slice %56 {offsets = [0, 24], sizes = [8, 8], strides = [1, 1]} : vector<8x32xf32> to vector<8x8xf32>
    %61 = vector.shape_cast %57 : vector<8x8xf32> to vector<1x8x8xf32>
    %62 = vector.shape_cast %58 : vector<8x8xf32> to vector<1x8x8xf32>
    %63 = vector.shape_cast %59 : vector<8x8xf32> to vector<1x8x8xf32>
    %64 = vector.shape_cast %60 : vector<8x8xf32> to vector<1x8x8xf32>
    %65 = tpu.concatenate %61, %62, %63, %64 in 0 : vector<1x8x8xf32>, vector<1x8x8xf32>, vector<1x8x8xf32>, vector<1x8x8xf32> -> vector<4x8x8xf32>
    %66 = arith.truncf %65 : vector<4x8x8xf32> to vector<4x8x8xbf16>
    "tpu.trace_start"() <{level = 10 : i32, message = "hqd,hkd->hqk"}> : () -> ()
    %cst_19 = arith.constant dense<0.000000e+00> : vector<4x8x8xf32>
    %67 = tpu.matmul %44, %55, %cst_19 {dimension_numbers = #tpu.dot_dimension_numbers<[2], [2], [1], [1], [0, 0, 0, 1, 1, 1], [0], [0]>} : vector<4x8x8xbf16>, vector<4x8x8xbf16>, vector<4x8x8xf32> -> vector<4x8x8xf32>
    "tpu.trace_stop"() : () -> ()
    %68 = vector.broadcast %0 : vector<1x1x8xf32> to vector<4x8x8xf32>
    %69 = arith.addf %67, %68 : vector<4x8x8xf32>
    %cst_20 = arith.constant dense<0xFF800000> : vector<4x8xf32>
    %70 = vector.multi_reduction <maximumf>, %69, %cst_20 [2] : vector<4x8x8xf32> to vector<4x8xf32>
    %71 = vector.shape_cast %70 : vector<4x8xf32> to vector<4x8x1xf32>
    %72 = vector.broadcast %71 : vector<4x8x1xf32> to vector<4x8x8xf32>
    %73 = arith.subf %69, %72 : vector<4x8x8xf32>
    %74 = math.exp %73 : vector<4x8x8xf32>
    %cst_21 = arith.constant dense<0.000000e+00> : vector<4x8xf32>
    %75 = vector.multi_reduction <add>, %74, %cst_21 [2] : vector<4x8x8xf32> to vector<4x8xf32>
    %76 = vector.shape_cast %75 : vector<4x8xf32> to vector<4x8x1xf32>
    %77 = tpu.reciprocal %76 : vector<4x8x1xf32> -> vector<4x8x1xf32>
    %78 = vector.broadcast %77 : vector<4x8x1xf32> to vector<4x8x8xf32>
    %79 = arith.mulf %74, %78 : vector<4x8x8xf32>
    %80 = arith.truncf %79 : vector<4x8x8xf32> to vector<4x8x8xbf16>
    "tpu.trace_start"() <{level = 10 : i32, message = "hqk,hkd->hqd"}> : () -> ()
    %cst_22 = arith.constant dense<0.000000e+00> : vector<4x8x8xf32>
    %81 = tpu.matmul %80, %66, %cst_22 {dimension_numbers = #tpu.dot_dimension_numbers<[2], [1], [1], [2], [0, 0, 0, 1, 1, 2], [0], [0]>} : vector<4x8x8xbf16>, vector<4x8x8xbf16>, vector<4x8x8xf32> -> vector<4x8x8xf32>
    "tpu.trace_stop"() : () -> ()
    %82 = vector.extract_strided_slice %81 {offsets = [0, 0, 0], sizes = [1, 8, 8], strides = [1, 1, 1]} : vector<4x8x8xf32> to vector<1x8x8xf32>
    %83 = vector.shape_cast %82 : vector<1x8x8xf32> to vector<8x8xf32>
    %84 = vector.extract_strided_slice %81 {offsets = [1, 0, 0], sizes = [1, 8, 8], strides = [1, 1, 1]} : vector<4x8x8xf32> to vector<1x8x8xf32>
    %85 = vector.shape_cast %84 : vector<1x8x8xf32> to vector<8x8xf32>
    %86 = vector.extract_strided_slice %81 {offsets = [2, 0, 0], sizes = [1, 8, 8], strides = [1, 1, 1]} : vector<4x8x8xf32> to vector<1x8x8xf32>
    %87 = vector.shape_cast %86 : vector<1x8x8xf32> to vector<8x8xf32>
    %88 = vector.extract_strided_slice %81 {offsets = [3, 0, 0], sizes = [1, 8, 8], strides = [1, 1, 1]} : vector<4x8x8xf32> to vector<1x8x8xf32>
    %89 = vector.shape_cast %88 : vector<1x8x8xf32> to vector<8x8xf32>
    %90 = tpu.concatenate %83, %85, %87, %89 in 1 : vector<8x8xf32>, vector<8x8xf32>, vector<8x8xf32>, vector<8x8xf32> -> vector<8x32xf32>
    %91 = arith.truncf %90 : vector<8x32xf32> to vector<8x32xbf16>
    %c0_23 = arith.constant 0 : index
    %c0_24 = arith.constant 0 : index
    %c0_25 = arith.constant 0 : index
    %92 = vector.load %arg7[%c0_23, %c0_24, %c0_25] : memref<2x32x32xbf16, #tpu.memory_space<vmem>>, vector<1x32x32xbf16>
    %93 = vector.shape_cast %92 : vector<1x32x32xbf16> to vector<32x32xbf16>
    %cst_26 = arith.constant dense<0.000000e+00> : vector<8x32xf32>
    %94 = tpu.matmul %91, %93, %cst_26 {dimension_numbers = #tpu.dot_dimension_numbers<[1], [0], [0], [1], [0, 0, 1, 1], [], []>} : vector<8x32xbf16>, vector<32x32xbf16>, vector<8x32xf32> -> vector<8x32xf32>
    %c0_27 = arith.constant 0 : index
    %c0_28 = arith.constant 0 : index
    %c0_29 = arith.constant 0 : index
    %95 = vector.load %arg8[%c0_27, %c0_28, %c0_29] : memref<2x1x32xf32, #tpu.memory_space<vmem>>, vector<1x1x32xf32>
    %96 = vector.shape_cast %95 : vector<1x1x32xf32> to vector<1x32xf32>
    %97 = vector.broadcast %96 : vector<1x32xf32> to vector<8x32xf32>
    %98 = arith.addf %94, %97 : vector<8x32xf32>
    %99 = arith.addf %98, %25 : vector<8x32xf32>
    %c0_30 = arith.constant 0 : index
    %c0_31 = arith.constant 0 : index
    %c0_32 = arith.constant 0 : index
    %100 = vector.load %arg9[%c0_30, %c0_31, %c0_32] : memref<2x1x32xf32, #tpu.memory_space<vmem>>, vector<1x1x32xf32>
    %101 = vector.shape_cast %100 : vector<1x1x32xf32> to vector<1x32xf32>
    %c0_33 = arith.constant 0 : index
    %c0_34 = arith.constant 0 : index
    %c0_35 = arith.constant 0 : index
    %102 = vector.load %arg10[%c0_33, %c0_34, %c0_35] : memref<2x1x32xf32, #tpu.memory_space<vmem>>, vector<1x1x32xf32>
    %103 = vector.shape_cast %102 : vector<1x1x32xf32> to vector<1x32xf32>
    %cst_36 = arith.constant dense<0.000000e+00> : vector<8xf32>
    %104 = vector.multi_reduction <add>, %99, %cst_36 [1] : vector<8x32xf32> to vector<8xf32>
    %105 = vector.shape_cast %104 : vector<8xf32> to vector<8x1xf32>
    %cst_37 = arith.constant 3.200000e+01 : f32
    %106 = vector.broadcast %cst_37 : f32 to vector<8x1xf32>
    %107 = arith.divf %105, %106 : vector<8x1xf32>
    %108 = vector.broadcast %107 : vector<8x1xf32> to vector<8x32xf32>
    %109 = arith.subf %99, %108 : vector<8x32xf32>
    %110 = arith.mulf %109, %109 : vector<8x32xf32>
    %cst_38 = arith.constant dense<0.000000e+00> : vector<8xf32>
    %111 = vector.multi_reduction <add>, %110, %cst_38 [1] : vector<8x32xf32> to vector<8xf32>
    %112 = vector.shape_cast %111 : vector<8xf32> to vector<8x1xf32>
    %cst_39 = arith.constant 3.200000e+01 : f32
    %113 = vector.broadcast %cst_39 : f32 to vector<8x1xf32>
    %114 = arith.divf %112, %113 : vector<8x1xf32>
    %115 = vector.broadcast %107 : vector<8x1xf32> to vector<8x32xf32>
    %116 = arith.subf %99, %115 : vector<8x32xf32>
    %cst_40 = arith.constant 9.99999996E-13 : f32
    %117 = vector.broadcast %cst_40 : f32 to vector<8x1xf32>
    %118 = arith.addf %114, %117 : vector<8x1xf32>
    %119 = math.rsqrt %118 : vector<8x1xf32>
    %120 = vector.broadcast %119 : vector<8x1xf32> to vector<8x32xf32>
    %121 = arith.mulf %116, %120 : vector<8x32xf32>
    %122 = vector.broadcast %101 : vector<1x32xf32> to vector<8x32xf32>
    %123 = arith.mulf %121, %122 : vector<8x32xf32>
    %124 = vector.broadcast %103 : vector<1x32xf32> to vector<8x32xf32>
    %125 = arith.addf %123, %124 : vector<8x32xf32>
    %126 = arith.truncf %125 : vector<8x32xf32> to vector<8x32xbf16>
    %c0_41 = arith.constant 0 : index
    %c0_42 = arith.constant 0 : index
    %c0_43 = arith.constant 0 : index
    %127 = vector.load %arg11[%c0_41, %c0_42, %c0_43] : memref<2x32x64xbf16, #tpu.memory_space<vmem>>, vector<1x32x64xbf16>
    %128 = vector.shape_cast %127 : vector<1x32x64xbf16> to vector<32x64xbf16>
    %cst_44 = arith.constant dense<0.000000e+00> : vector<8x64xf32>
    %129 = tpu.matmul %126, %128, %cst_44 {dimension_numbers = #tpu.dot_dimension_numbers<[1], [0], [0], [1], [0, 0, 1, 1], [], []>} : vector<8x32xbf16>, vector<32x64xbf16>, vector<8x64xf32> -> vector<8x64xf32>
    %c0_45 = arith.constant 0 : index
    %c0_46 = arith.constant 0 : index
    %c0_47 = arith.constant 0 : index
    %130 = vector.load %arg12[%c0_45, %c0_46, %c0_47] : memref<2x1x64xf32, #tpu.memory_space<vmem>>, vector<1x1x64xf32>
    %131 = vector.shape_cast %130 : vector<1x1x64xf32> to vector<1x64xf32>
    %132 = vector.broadcast %131 : vector<1x64xf32> to vector<8x64xf32>
    %133 = arith.addf %129, %132 : vector<8x64xf32>
    %cst_48 = arith.constant 5.000000e-01 : f32
    %134 = vector.broadcast %cst_48 : f32 to vector<8x64xf32>
    %135 = arith.mulf %134, %133 : vector<8x64xf32>
    %cst_49 = arith.constant 4.471500e-02 : f32
    %136 = vector.broadcast %cst_49 : f32 to vector<8x64xf32>
    %137 = arith.mulf %136, %133 : vector<8x64xf32>
    %138 = arith.mulf %137, %133 : vector<8x64xf32>
    %139 = arith.mulf %138, %133 : vector<8x64xf32>
    %140 = arith.addf %133, %139 : vector<8x64xf32>
    %cst_50 = arith.constant 0.797884583 : f32
    %141 = vector.broadcast %cst_50 : f32 to vector<8x64xf32>
    %142 = arith.mulf %141, %140 : vector<8x64xf32>
    %143 = math.tanh %142 : vector<8x64xf32>
    %cst_51 = arith.constant 1.000000e+00 : f32
    %144 = vector.broadcast %cst_51 : f32 to vector<8x64xf32>
    %145 = arith.addf %144, %143 : vector<8x64xf32>
    %146 = arith.mulf %135, %145 : vector<8x64xf32>
    %147 = arith.truncf %146 : vector<8x64xf32> to vector<8x64xbf16>
    %c0_52 = arith.constant 0 : index
    %c0_53 = arith.constant 0 : index
    %c0_54 = arith.constant 0 : index
    %148 = vector.load %arg13[%c0_52, %c0_53, %c0_54] : memref<2x64x32xbf16, #tpu.memory_space<vmem>>, vector<1x64x32xbf16>
    %149 = vector.shape_cast %148 : vector<1x64x32xbf16> to vector<64x32xbf16>
    %cst_55 = arith.constant dense<0.000000e+00> : vector<8x32xf32>
    %150 = tpu.matmul %147, %149, %cst_55 {dimension_numbers = #tpu.dot_dimension_numbers<[1], [0], [0], [1], [0, 0, 1, 1], [], []>} : vector<8x64xbf16>, vector<64x32xbf16>, vector<8x32xf32> -> vector<8x32xf32>
    %c0_56 = arith.constant 0 : index
    %c0_57 = arith.constant 0 : index
    %c0_58 = arith.constant 0 : index
    %151 = vector.load %arg14[%c0_56, %c0_57, %c0_58] : memref<2x1x32xf32, #tpu.memory_space<vmem>>, vector<1x1x32xf32>
    %152 = vector.shape_cast %151 : vector<1x1x32xf32> to vector<1x32xf32>
    %153 = vector.broadcast %152 : vector<1x32xf32> to vector<8x32xf32>
    %154 = arith.addf %150, %153 : vector<8x32xf32>
    %155 = arith.addf %154, %125 : vector<8x32xf32>
    %c0_59 = arith.constant 0 : index
    %c0_60 = arith.constant 0 : index
    %c0_61 = arith.constant 0 : index
    %156 = vector.load %arg15[%c0_59, %c0_60, %c0_61] : memref<2x1x32xf32, #tpu.memory_space<vmem>>, vector<1x1x32xf32>
    %157 = vector.shape_cast %156 : vector<1x1x32xf32> to vector<1x32xf32>
    %c0_62 = arith.constant 0 : index
    %c0_63 = arith.constant 0 : index
    %c0_64 = arith.constant 0 : index
    %158 = vector.load %arg16[%c0_62, %c0_63, %c0_64] : memref<2x1x32xf32, #tpu.memory_space<vmem>>, vector<1x1x32xf32>
    %159 = vector.shape_cast %158 : vector<1x1x32xf32> to vector<1x32xf32>
    %cst_65 = arith.constant dense<0.000000e+00> : vector<8xf32>
    %160 = vector.multi_reduction <add>, %155, %cst_65 [1] : vector<8x32xf32> to vector<8xf32>
    %161 = vector.shape_cast %160 : vector<8xf32> to vector<8x1xf32>
    %cst_66 = arith.constant 3.200000e+01 : f32
    %162 = vector.broadcast %cst_66 : f32 to vector<8x1xf32>
    %163 = arith.divf %161, %162 : vector<8x1xf32>
    %164 = vector.broadcast %163 : vector<8x1xf32> to vector<8x32xf32>
    %165 = arith.subf %155, %164 : vector<8x32xf32>
    %166 = arith.mulf %165, %165 : vector<8x32xf32>
    %cst_67 = arith.constant dense<0.000000e+00> : vector<8xf32>
    %167 = vector.multi_reduction <add>, %166, %cst_67 [1] : vector<8x32xf32> to vector<8xf32>
    %168 = vector.shape_cast %167 : vector<8xf32> to vector<8x1xf32>
    %cst_68 = arith.constant 3.200000e+01 : f32
    %169 = vector.broadcast %cst_68 : f32 to vector<8x1xf32>
    %170 = arith.divf %168, %169 : vector<8x1xf32>
    %171 = vector.broadcast %163 : vector<8x1xf32> to vector<8x32xf32>
    %172 = arith.subf %155, %171 : vector<8x32xf32>
    %cst_69 = arith.constant 9.99999996E-13 : f32
    %173 = vector.broadcast %cst_69 : f32 to vector<8x1xf32>
    %174 = arith.addf %170, %173 : vector<8x1xf32>
    %175 = math.rsqrt %174 : vector<8x1xf32>
    %176 = vector.broadcast %175 : vector<8x1xf32> to vector<8x32xf32>
    %177 = arith.mulf %172, %176 : vector<8x32xf32>
    %178 = vector.broadcast %157 : vector<1x32xf32> to vector<8x32xf32>
    %179 = arith.mulf %177, %178 : vector<8x32xf32>
    %180 = vector.broadcast %159 : vector<1x32xf32> to vector<8x32xf32>
    %181 = arith.addf %179, %180 : vector<8x32xf32>
    %182 = arith.truncf %181 : vector<8x32xf32> to vector<8x32xbf16>
    %c1 = arith.constant 1 : index
    %c0_70 = arith.constant 0 : index
    %c0_71 = arith.constant 0 : index
    %183 = vector.load %arg5[%c1, %c0_70, %c0_71] : memref<2x32x96xbf16, #tpu.memory_space<vmem>>, vector<1x32x96xbf16>
    %184 = vector.shape_cast %183 : vector<1x32x96xbf16> to vector<32x96xbf16>
    %cst_72 = arith.constant dense<0.000000e+00> : vector<8x96xf32>
    %185 = tpu.matmul %182, %184, %cst_72 {dimension_numbers = #tpu.dot_dimension_numbers<[1], [0], [0], [1], [0, 0, 1, 1], [], []>} : vector<8x32xbf16>, vector<32x96xbf16>, vector<8x96xf32> -> vector<8x96xf32>
    %c1_73 = arith.constant 1 : index
    %c0_74 = arith.constant 0 : index
    %c0_75 = arith.constant 0 : index
    %186 = vector.load %arg6[%c1_73, %c0_74, %c0_75] : memref<2x1x96xf32, #tpu.memory_space<vmem>>, vector<1x1x96xf32>
    %187 = vector.shape_cast %186 : vector<1x1x96xf32> to vector<1x96xf32>
    %188 = vector.broadcast %187 : vector<1x96xf32> to vector<8x96xf32>
    %189 = arith.addf %185, %188 : vector<8x96xf32>
    %190 = vector.extract_strided_slice %189 {offsets = [0, 0], sizes = [8, 32], strides = [1, 1]} : vector<8x96xf32> to vector<8x32xf32>
    %191 = vector.extract_strided_slice %190 {offsets = [0, 0], sizes = [8, 8], strides = [1, 1]} : vector<8x32xf32> to vector<8x8xf32>
    %192 = vector.extract_strided_slice %190 {offsets = [0, 8], sizes = [8, 8], strides = [1, 1]} : vector<8x32xf32> to vector<8x8xf32>
    %193 = vector.extract_strided_slice %190 {offsets = [0, 16], sizes = [8, 8], strides = [1, 1]} : vector<8x32xf32> to vector<8x8xf32>
    %194 = vector.extract_strided_slice %190 {offsets = [0, 24], sizes = [8, 8], strides = [1, 1]} : vector<8x32xf32> to vector<8x8xf32>
    %195 = vector.shape_cast %191 : vector<8x8xf32> to vector<1x8x8xf32>
    %196 = vector.shape_cast %192 : vector<8x8xf32> to vector<1x8x8xf32>
    %197 = vector.shape_cast %193 : vector<8x8xf32> to vector<1x8x8xf32>
    %198 = vector.shape_cast %194 : vector<8x8xf32> to vector<1x8x8xf32>
    %199 = tpu.concatenate %195, %196, %197, %198 in 0 : vector<1x8x8xf32>, vector<1x8x8xf32>, vector<1x8x8xf32>, vector<1x8x8xf32> -> vector<4x8x8xf32>
    %200 = arith.truncf %199 : vector<4x8x8xf32> to vector<4x8x8xbf16>
    %201 = vector.extract_strided_slice %189 {offsets = [0, 32], sizes = [8, 32], strides = [1, 1]} : vector<8x96xf32> to vector<8x32xf32>
    %202 = vector.extract_strided_slice %201 {offsets = [0, 0], sizes = [8, 8], strides = [1, 1]} : vector<8x32xf32> to vector<8x8xf32>
    %203 = vector.extract_strided_slice %201 {offsets = [0, 8], sizes = [8, 8], strides = [1, 1]} : vector<8x32xf32> to vector<8x8xf32>
    %204 = vector.extract_strided_slice %201 {offsets = [0, 16], sizes = [8, 8], strides = [1, 1]} : vector<8x32xf32> to vector<8x8xf32>
    %205 = vector.extract_strided_slice %201 {offsets = [0, 24], sizes = [8, 8], strides = [1, 1]} : vector<8x32xf32> to vector<8x8xf32>
    %206 = vector.shape_cast %202 : vector<8x8xf32> to vector<1x8x8xf32>
    %207 = vector.shape_cast %203 : vector<8x8xf32> to vector<1x8x8xf32>
    %208 = vector.shape_cast %204 : vector<8x8xf32> to vector<1x8x8xf32>
    %209 = vector.shape_cast %205 : vector<8x8xf32> to vector<1x8x8xf32>
    %210 = tpu.concatenate %206, %207, %208, %209 in 0 : vector<1x8x8xf32>, vector<1x8x8xf32>, vector<1x8x8xf32>, vector<1x8x8xf32> -> vector<4x8x8xf32>
    %211 = arith.truncf %210 : vector<4x8x8xf32> to vector<4x8x8xbf16>
    %212 = vector.extract_strided_slice %189 {offsets = [0, 64], sizes = [8, 32], strides = [1, 1]} : vector<8x96xf32> to vector<8x32xf32>
    %213 = vector.extract_strided_slice %212 {offsets = [0, 0], sizes = [8, 8], strides = [1, 1]} : vector<8x32xf32> to vector<8x8xf32>
    %214 = vector.extract_strided_slice %212 {offsets = [0, 8], sizes = [8, 8], strides = [1, 1]} : vector<8x32xf32> to vector<8x8xf32>
    %215 = vector.extract_strided_slice %212 {offsets = [0, 16], sizes = [8, 8], strides = [1, 1]} : vector<8x32xf32> to vector<8x8xf32>
    %216 = vector.extract_strided_slice %212 {offsets = [0, 24], sizes = [8, 8], strides = [1, 1]} : vector<8x32xf32> to vector<8x8xf32>
    %217 = vector.shape_cast %213 : vector<8x8xf32> to vector<1x8x8xf32>
    %218 = vector.shape_cast %214 : vector<8x8xf32> to vector<1x8x8xf32>
    %219 = vector.shape_cast %215 : vector<8x8xf32> to vector<1x8x8xf32>
    %220 = vector.shape_cast %216 : vector<8x8xf32> to vector<1x8x8xf32>
    %221 = tpu.concatenate %217, %218, %219, %220 in 0 : vector<1x8x8xf32>, vector<1x8x8xf32>, vector<1x8x8xf32>, vector<1x8x8xf32> -> vector<4x8x8xf32>
    %222 = arith.truncf %221 : vector<4x8x8xf32> to vector<4x8x8xbf16>
    "tpu.trace_start"() <{level = 10 : i32, message = "hqd,hkd->hqk"}> : () -> ()
    %cst_76 = arith.constant dense<0.000000e+00> : vector<4x8x8xf32>
    %223 = tpu.matmul %200, %211, %cst_76 {dimension_numbers = #tpu.dot_dimension_numbers<[2], [2], [1], [1], [0, 0, 0, 1, 1, 1], [0], [0]>} : vector<4x8x8xbf16>, vector<4x8x8xbf16>, vector<4x8x8xf32> -> vector<4x8x8xf32>
    "tpu.trace_stop"() : () -> ()
    %224 = vector.broadcast %0 : vector<1x1x8xf32> to vector<4x8x8xf32>
    %225 = arith.addf %223, %224 : vector<4x8x8xf32>
    %cst_77 = arith.constant dense<0xFF800000> : vector<4x8xf32>
    %226 = vector.multi_reduction <maximumf>, %225, %cst_77 [2] : vector<4x8x8xf32> to vector<4x8xf32>
    %227 = vector.shape_cast %226 : vector<4x8xf32> to vector<4x8x1xf32>
    %228 = vector.broadcast %227 : vector<4x8x1xf32> to vector<4x8x8xf32>
    %229 = arith.subf %225, %228 : vector<4x8x8xf32>
    %230 = math.exp %229 : vector<4x8x8xf32>
    %cst_78 = arith.constant dense<0.000000e+00> : vector<4x8xf32>
    %231 = vector.multi_reduction <add>, %230, %cst_78 [2] : vector<4x8x8xf32> to vector<4x8xf32>
    %232 = vector.shape_cast %231 : vector<4x8xf32> to vector<4x8x1xf32>
    %233 = tpu.reciprocal %232 : vector<4x8x1xf32> -> vector<4x8x1xf32>
    %234 = vector.broadcast %233 : vector<4x8x1xf32> to vector<4x8x8xf32>
    %235 = arith.mulf %230, %234 : vector<4x8x8xf32>
    %236 = arith.truncf %235 : vector<4x8x8xf32> to vector<4x8x8xbf16>
    "tpu.trace_start"() <{level = 10 : i32, message = "hqk,hkd->hqd"}> : () -> ()
    %cst_79 = arith.constant dense<0.000000e+00> : vector<4x8x8xf32>
    %237 = tpu.matmul %236, %222, %cst_79 {dimension_numbers = #tpu.dot_dimension_numbers<[2], [1], [1], [2], [0, 0, 0, 1, 1, 2], [0], [0]>} : vector<4x8x8xbf16>, vector<4x8x8xbf16>, vector<4x8x8xf32> -> vector<4x8x8xf32>
    "tpu.trace_stop"() : () -> ()
    %238 = vector.extract_strided_slice %237 {offsets = [0, 0, 0], sizes = [1, 8, 8], strides = [1, 1, 1]} : vector<4x8x8xf32> to vector<1x8x8xf32>
    %239 = vector.shape_cast %238 : vector<1x8x8xf32> to vector<8x8xf32>
    %240 = vector.extract_strided_slice %237 {offsets = [1, 0, 0], sizes = [1, 8, 8], strides = [1, 1, 1]} : vector<4x8x8xf32> to vector<1x8x8xf32>
    %241 = vector.shape_cast %240 : vector<1x8x8xf32> to vector<8x8xf32>
    %242 = vector.extract_strided_slice %237 {offsets = [2, 0, 0], sizes = [1, 8, 8], strides = [1, 1, 1]} : vector<4x8x8xf32> to vector<1x8x8xf32>
    %243 = vector.shape_cast %242 : vector<1x8x8xf32> to vector<8x8xf32>
    %244 = vector.extract_strided_slice %237 {offsets = [3, 0, 0], sizes = [1, 8, 8], strides = [1, 1, 1]} : vector<4x8x8xf32> to vector<1x8x8xf32>
    %245 = vector.shape_cast %244 : vector<1x8x8xf32> to vector<8x8xf32>
    %246 = tpu.concatenate %239, %241, %243, %245 in 1 : vector<8x8xf32>, vector<8x8xf32>, vector<8x8xf32>, vector<8x8xf32> -> vector<8x32xf32>
    %247 = arith.truncf %246 : vector<8x32xf32> to vector<8x32xbf16>
    %c1_80 = arith.constant 1 : index
    %c0_81 = arith.constant 0 : index
    %c0_82 = arith.constant 0 : index
    %248 = vector.load %arg7[%c1_80, %c0_81, %c0_82] : memref<2x32x32xbf16, #tpu.memory_space<vmem>>, vector<1x32x32xbf16>
    %249 = vector.shape_cast %248 : vector<1x32x32xbf16> to vector<32x32xbf16>
    %cst_83 = arith.constant dense<0.000000e+00> : vector<8x32xf32>
    %250 = tpu.matmul %247, %249, %cst_83 {dimension_numbers = #tpu.dot_dimension_numbers<[1], [0], [0], [1], [0, 0, 1, 1], [], []>} : vector<8x32xbf16>, vector<32x32xbf16>, vector<8x32xf32> -> vector<8x32xf32>
    %c1_84 = arith.constant 1 : index
    %c0_85 = arith.constant 0 : index
    %c0_86 = arith.constant 0 : index
    %251 = vector.load %arg8[%c1_84, %c0_85, %c0_86] : memref<2x1x32xf32, #tpu.memory_space<vmem>>, vector<1x1x32xf32>
    %252 = vector.shape_cast %251 : vector<1x1x32xf32> to vector<1x32xf32>
    %253 = vector.broadcast %252 : vector<1x32xf32> to vector<8x32xf32>
    %254 = arith.addf %250, %253 : vector<8x32xf32>
    %255 = arith.addf %254, %181 : vector<8x32xf32>
    %c1_87 = arith.constant 1 : index
    %c0_88 = arith.constant 0 : index
    %c0_89 = arith.constant 0 : index
    %256 = vector.load %arg9[%c1_87, %c0_88, %c0_89] : memref<2x1x32xf32, #tpu.memory_space<vmem>>, vector<1x1x32xf32>
    %257 = vector.shape_cast %256 : vector<1x1x32xf32> to vector<1x32xf32>
    %c1_90 = arith.constant 1 : index
    %c0_91 = arith.constant 0 : index
    %c0_92 = arith.constant 0 : index
    %258 = vector.load %arg10[%c1_90, %c0_91, %c0_92] : memref<2x1x32xf32, #tpu.memory_space<vmem>>, vector<1x1x32xf32>
    %259 = vector.shape_cast %258 : vector<1x1x32xf32> to vector<1x32xf32>
    %cst_93 = arith.constant dense<0.000000e+00> : vector<8xf32>
    %260 = vector.multi_reduction <add>, %255, %cst_93 [1] : vector<8x32xf32> to vector<8xf32>
    %261 = vector.shape_cast %260 : vector<8xf32> to vector<8x1xf32>
    %cst_94 = arith.constant 3.200000e+01 : f32
    %262 = vector.broadcast %cst_94 : f32 to vector<8x1xf32>
    %263 = arith.divf %261, %262 : vector<8x1xf32>
    %264 = vector.broadcast %263 : vector<8x1xf32> to vector<8x32xf32>
    %265 = arith.subf %255, %264 : vector<8x32xf32>
    %266 = arith.mulf %265, %265 : vector<8x32xf32>
    %cst_95 = arith.constant dense<0.000000e+00> : vector<8xf32>
    %267 = vector.multi_reduction <add>, %266, %cst_95 [1] : vector<8x32xf32> to vector<8xf32>
    %268 = vector.shape_cast %267 : vector<8xf32> to vector<8x1xf32>
    %cst_96 = arith.constant 3.200000e+01 : f32
    %269 = vector.broadcast %cst_96 : f32 to vector<8x1xf32>
    %270 = arith.divf %268, %269 : vector<8x1xf32>
    %271 = vector.broadcast %263 : vector<8x1xf32> to vector<8x32xf32>
    %272 = arith.subf %255, %271 : vector<8x32xf32>
    %cst_97 = arith.constant 9.99999996E-13 : f32
    %273 = vector.broadcast %cst_97 : f32 to vector<8x1xf32>
    %274 = arith.addf %270, %273 : vector<8x1xf32>
    %275 = math.rsqrt %274 : vector<8x1xf32>
    %276 = vector.broadcast %275 : vector<8x1xf32> to vector<8x32xf32>
    %277 = arith.mulf %272, %276 : vector<8x32xf32>
    %278 = vector.broadcast %257 : vector<1x32xf32> to vector<8x32xf32>
    %279 = arith.mulf %277, %278 : vector<8x32xf32>
    %280 = vector.broadcast %259 : vector<1x32xf32> to vector<8x32xf32>
    %281 = arith.addf %279, %280 : vector<8x32xf32>
    %282 = arith.truncf %281 : vector<8x32xf32> to vector<8x32xbf16>
    %c1_98 = arith.constant 1 : index
    %c0_99 = arith.constant 0 : index
    %c0_100 = arith.constant 0 : index
    %283 = vector.load %arg11[%c1_98, %c0_99, %c0_100] : memref<2x32x64xbf16, #tpu.memory_space<vmem>>, vector<1x32x64xbf16>
    %284 = vector.shape_cast %283 : vector<1x32x64xbf16> to vector<32x64xbf16>
    %cst_101 = arith.constant dense<0.000000e+00> : vector<8x64xf32>
    %285 = tpu.matmul %282, %284, %cst_101 {dimension_numbers = #tpu.dot_dimension_numbers<[1], [0], [0], [1], [0, 0, 1, 1], [], []>} : vector<8x32xbf16>, vector<32x64xbf16>, vector<8x64xf32> -> vector<8x64xf32>
    %c1_102 = arith.constant 1 : index
    %c0_103 = arith.constant 0 : index
    %c0_104 = arith.constant 0 : index
    %286 = vector.load %arg12[%c1_102, %c0_103, %c0_104] : memref<2x1x64xf32, #tpu.memory_space<vmem>>, vector<1x1x64xf32>
    %287 = vector.shape_cast %286 : vector<1x1x64xf32> to vector<1x64xf32>
    %288 = vector.broadcast %287 : vector<1x64xf32> to vector<8x64xf32>
    %289 = arith.addf %285, %288 : vector<8x64xf32>
    %cst_105 = arith.constant 5.000000e-01 : f32
    %290 = vector.broadcast %cst_105 : f32 to vector<8x64xf32>
    %291 = arith.mulf %290, %289 : vector<8x64xf32>
    %cst_106 = arith.constant 4.471500e-02 : f32
    %292 = vector.broadcast %cst_106 : f32 to vector<8x64xf32>
    %293 = arith.mulf %292, %289 : vector<8x64xf32>
    %294 = arith.mulf %293, %289 : vector<8x64xf32>
    %295 = arith.mulf %294, %289 : vector<8x64xf32>
    %296 = arith.addf %289, %295 : vector<8x64xf32>
    %cst_107 = arith.constant 0.797884583 : f32
    %297 = vector.broadcast %cst_107 : f32 to vector<8x64xf32>
    %298 = arith.mulf %297, %296 : vector<8x64xf32>
    %299 = math.tanh %298 : vector<8x64xf32>
    %cst_108 = arith.constant 1.000000e+00 : f32
    %300 = vector.broadcast %cst_108 : f32 to vector<8x64xf32>
    %301 = arith.addf %300, %299 : vector<8x64xf32>
    %302 = arith.mulf %291, %301 : vector<8x64xf32>
    %303 = arith.truncf %302 : vector<8x64xf32> to vector<8x64xbf16>
    %c1_109 = arith.constant 1 : index
    %c0_110 = arith.constant 0 : index
    %c0_111 = arith.constant 0 : index
    %304 = vector.load %arg13[%c1_109, %c0_110, %c0_111] : memref<2x64x32xbf16, #tpu.memory_space<vmem>>, vector<1x64x32xbf16>
    %305 = vector.shape_cast %304 : vector<1x64x32xbf16> to vector<64x32xbf16>
    %cst_112 = arith.constant dense<0.000000e+00> : vector<8x32xf32>
    %306 = tpu.matmul %303, %305, %cst_112 {dimension_numbers = #tpu.dot_dimension_numbers<[1], [0], [0], [1], [0, 0, 1, 1], [], []>} : vector<8x64xbf16>, vector<64x32xbf16>, vector<8x32xf32> -> vector<8x32xf32>
    %c1_113 = arith.constant 1 : index
    %c0_114 = arith.constant 0 : index
    %c0_115 = arith.constant 0 : index
    %307 = vector.load %arg14[%c1_113, %c0_114, %c0_115] : memref<2x1x32xf32, #tpu.memory_space<vmem>>, vector<1x1x32xf32>
    %308 = vector.shape_cast %307 : vector<1x1x32xf32> to vector<1x32xf32>
    %309 = vector.broadcast %308 : vector<1x32xf32> to vector<8x32xf32>
    %310 = arith.addf %306, %309 : vector<8x32xf32>
    %311 = arith.addf %310, %281 : vector<8x32xf32>
    %c1_116 = arith.constant 1 : index
    %c0_117 = arith.constant 0 : index
    %c0_118 = arith.constant 0 : index
    %312 = vector.load %arg15[%c1_116, %c0_117, %c0_118] : memref<2x1x32xf32, #tpu.memory_space<vmem>>, vector<1x1x32xf32>
    %313 = vector.shape_cast %312 : vector<1x1x32xf32> to vector<1x32xf32>
    %c1_119 = arith.constant 1 : index
    %c0_120 = arith.constant 0 : index
    %c0_121 = arith.constant 0 : index
    %314 = vector.load %arg16[%c1_119, %c0_120, %c0_121] : memref<2x1x32xf32, #tpu.memory_space<vmem>>, vector<1x1x32xf32>
    %315 = vector.shape_cast %314 : vector<1x1x32xf32> to vector<1x32xf32>
    %cst_122 = arith.constant dense<0.000000e+00> : vector<8xf32>
    %316 = vector.multi_reduction <add>, %311, %cst_122 [1] : vector<8x32xf32> to vector<8xf32>
    %317 = vector.shape_cast %316 : vector<8xf32> to vector<8x1xf32>
    %cst_123 = arith.constant 3.200000e+01 : f32
    %318 = vector.broadcast %cst_123 : f32 to vector<8x1xf32>
    %319 = arith.divf %317, %318 : vector<8x1xf32>
    %320 = vector.broadcast %319 : vector<8x1xf32> to vector<8x32xf32>
    %321 = arith.subf %311, %320 : vector<8x32xf32>
    %322 = arith.mulf %321, %321 : vector<8x32xf32>
    %cst_124 = arith.constant dense<0.000000e+00> : vector<8xf32>
    %323 = vector.multi_reduction <add>, %322, %cst_124 [1] : vector<8x32xf32> to vector<8xf32>
    %324 = vector.shape_cast %323 : vector<8xf32> to vector<8x1xf32>
    %cst_125 = arith.constant 3.200000e+01 : f32
    %325 = vector.broadcast %cst_125 : f32 to vector<8x1xf32>
    %326 = arith.divf %324, %325 : vector<8x1xf32>
    %327 = vector.broadcast %319 : vector<8x1xf32> to vector<8x32xf32>
    %328 = arith.subf %311, %327 : vector<8x32xf32>
    %cst_126 = arith.constant 9.99999996E-13 : f32
    %329 = vector.broadcast %cst_126 : f32 to vector<8x1xf32>
    %330 = arith.addf %326, %329 : vector<8x1xf32>
    %331 = math.rsqrt %330 : vector<8x1xf32>
    %332 = vector.broadcast %331 : vector<8x1xf32> to vector<8x32xf32>
    %333 = arith.mulf %328, %332 : vector<8x32xf32>
    %334 = vector.broadcast %313 : vector<1x32xf32> to vector<8x32xf32>
    %335 = arith.mulf %333, %334 : vector<8x32xf32>
    %336 = vector.broadcast %315 : vector<1x32xf32> to vector<8x32xf32>
    %337 = arith.addf %335, %336 : vector<8x32xf32>
    %338 = vector.extract_strided_slice %337 {offsets = [0, 0], sizes = [1, 32], strides = [1, 1]} : vector<8x32xf32> to vector<1x32xf32>
    %339 = arith.truncf %338 : vector<1x32xf32> to vector<1x32xbf16>
    %c0_127 = arith.constant 0 : index
    %c0_128 = arith.constant 0 : index
    %340 = vector.load %arg17[%c0_127, %c0_128] : memref<32x32xbf16, #tpu.memory_space<vmem>>, vector<32x32xbf16>
    %cst_129 = arith.constant dense<0.000000e+00> : vector<1x32xf32>
    %341 = tpu.matmul %339, %340, %cst_129 {dimension_numbers = #tpu.dot_dimension_numbers<[1], [0], [0], [1], [0, 0, 1, 1], [], []>} : vector<1x32xbf16>, vector<32x32xbf16>, vector<1x32xf32> -> vector<1x32xf32>
    %c0_130 = arith.constant 0 : index
    %c0_131 = arith.constant 0 : index
    %342 = vector.load %arg18[%c0_130, %c0_131] : memref<1x32xf32, #tpu.memory_space<vmem>>, vector<1x32xf32>
    %343 = arith.addf %341, %342 : vector<1x32xf32>
    %344 = math.tanh %343 : vector<1x32xf32>
    %345 = arith.truncf %344 : vector<1x32xf32> to vector<1x32xbf16>
    %c0_132 = arith.constant 0 : index
    %c0_133 = arith.constant 0 : index
    %346 = vector.load %arg19[%c0_132, %c0_133] : memref<32x7xbf16, #tpu.memory_space<vmem>>, vector<32x7xbf16>
    %cst_134 = arith.constant dense<0.000000e+00> : vector<1x7xf32>
    %347 = tpu.matmul %345, %346, %cst_134 {dimension_numbers = #tpu.dot_dimension_numbers<[1], [0], [0], [1], [0, 0, 1, 1], [], []>} : vector<1x32xbf16>, vector<32x7xbf16>, vector<1x7xf32> -> vector<1x7xf32>
    %c0_135 = arith.constant 0 : index
    %c0_136 = arith.constant 0 : index
    %348 = vector.load %arg20[%c0_135, %c0_136] : memref<1x7xf32, #tpu.memory_space<vmem>>, vector<1x7xf32>
    %349 = arith.addf %347, %348 : vector<1x7xf32>
    %350 = vector.shape_cast %349 : vector<1x7xf32> to vector<1x1x7xf32>
    %c0_137 = arith.constant 0 : index
    %c0_138 = arith.constant 0 : index
    %c0_139 = arith.constant 0 : index
    %351 = vector.load %arg21[%c0_137, %c0_138, %c0_139] : memref<1x1x7xf32, #tpu.memory_space<vmem>>, vector<1x1x7xf32>
    tpu.vector_store %arg21[%c0_137, %c0_138, %c0_139], %350 {strides = array<i32>} : memref<1x1x7xf32, #tpu.memory_space<vmem>>, vector<1x1x7xf32>,
    return
  }
  func.func @transform_0(%arg0: i32) -> (i32, i32) {
    %c0_i32 = arith.constant 0 : i32
    %c0_i32_0 = arith.constant 0 : i32
    return %arg0, %c0_i32 : i32, i32
  }
  func.func @transform_1(%arg0: i32) -> (i32, i32, i32) {
    %c0_i32 = arith.constant 0 : i32
    %c0_i32_0 = arith.constant 0 : i32
    %c0_i32_1 = arith.constant 0 : i32
    return %arg0, %c0_i32, %c0_i32_0 : i32, i32, i32
  }
  func.func @transform_2(%arg0: i32) -> (i32, i32) {
    %c0_i32 = arith.constant 0 : i32
    %c0_i32_0 = arith.constant 0 : i32
    %c0_i32_1 = arith.constant 0 : i32
    return %c0_i32, %c0_i32_0 : i32, i32
  }
  func.func @transform_3(%arg0: i32) -> (i32, i32) {
    %c0_i32 = arith.constant 0 : i32
    %c0_i32_0 = arith.constant 0 : i32
    %c0_i32_1 = arith.constant 0 : i32
    return %c0_i32, %c0_i32_0 : i32, i32
  }
  func.func @transform_4(%arg0: i32) -> (i32, i32, i32) {
    %c0_i32 = arith.constant 0 : i32
    %c0_i32_0 = arith.constant 0 : i32
    %c0_i32_1 = arith.constant 0 : i32
    %c0_i32_2 = arith.constant 0 : i32
    return %c0_i32, %c0_i32_0, %c0_i32_1 : i32, i32, i32
  }
  func.func @transform_5(%arg0: i32) -> (i32, i32, i32) {
    %c0_i32 = arith.constant 0 : i32
    %c0_i32_0 = arith.constant 0 : i32
    %c0_i32_1 = arith.constant 0 : i32
    %c0_i32_2 = arith.constant 0 : i32
    return %c0_i32, %c0_i32_0, %c0_i32_1 : i32, i32, i32
  }
  func.func @transform_6(%arg0: i32) -> (i32, i32, i32) {
    %c0_i32 = arith.constant 0 : i32
    %c0_i32_0 = arith.constant 0 : i32
    %c0_i32_1 = arith.constant 0 : i32
    %c0_i32_2 = arith.constant 0 : i32
    return %c0_i32, %c0_i32_0, %c0_i32_1 : i32, i32, i32
  }
  func.func @transform_7(%arg0: i32) -> (i32, i32, i32) {
    %c0_i32 = arith.constant 0 : i32
    %c0_i32_0 = arith.constant 0 : i32
    %c0_i32_1 = arith.constant 0 : i32
    %c0_i32_2 = arith.constant 0 : i32
    return %c0_i32, %c0_i32_0, %c0_i32_1 : i32, i32, i32
  }
  func.func @transform_8(%arg0: i32) -> (i32, i32, i32) {
    %c0_i32 = arith.constant 0 : i32
    %c0_i32_0 = arith.constant 0 : i32
    %c0_i32_1 = arith.constant 0 : i32
    %c0_i32_2 = arith.constant 0 : i32
    return %c0_i32, %c0_i32_0, %c0_i32_1 : i32, i32, i32
  }
  func.func @transform_9(%arg0: i32) -> (i32, i32, i32) {
    %c0_i32 = arith.constant 0 : i32
    %c0_i32_0 = arith.constant 0 : i32
    %c0_i32_1 = arith.constant 0 : i32
    %c0_i32_2 = arith.constant 0 : i32
    return %c0_i32, %c0_i32_0, %c0_i32_1 : i32, i32, i32
  }
  func.func @transform_10(%arg0: i32) -> (i32, i32, i32) {
    %c0_i32 = arith.constant 0 : i32
    %c0_i32_0 = arith.constant 0 : i32
    %c0_i32_1 = arith.constant 0 : i32
    %c0_i32_2 = arith.constant 0 : i32
    return %c0_i32, %c0_i32_0, %c0_i32_1 : i32, i32, i32
  }
  func.func @transform_11(%arg0: i32) -> (i32, i32, i32) {
    %c0_i32 = arith.constant 0 : i32
    %c0_i32_0 = arith.constant 0 : i32
    %c0_i32_1 = arith.constant 0 : i32
    %c0_i32_2 = arith.constant 0 : i32
    return %c0_i32, %c0_i32_0, %c0_i32_1 : i32, i32, i32
  }
  func.func @transform_12(%arg0: i32) -> (i32, i32, i32) {
    %c0_i32 = arith.constant 0 : i32
    %c0_i32_0 = arith.constant 0 : i32
    %c0_i32_1 = arith.constant 0 : i32
    %c0_i32_2 = arith.constant 0 : i32
    return %c0_i32, %c0_i32_0, %c0_i32_1 : i32, i32, i32
  }
  func.func @transform_13(%arg0: i32) -> (i32, i32, i32) {
    %c0_i32 = arith.constant 0 : i32
    %c0_i32_0 = arith.constant 0 : i32
    %c0_i32_1 = arith.constant 0 : i32
    %c0_i32_2 = arith.constant 0 : i32
    return %c0_i32, %c0_i32_0, %c0_i32_1 : i32, i32, i32
  }
  func.func @transform_14(%arg0: i32) -> (i32, i32, i32) {
    %c0_i32 = arith.constant 0 : i32
    %c0_i32_0 = arith.constant 0 : i32
    %c0_i32_1 = arith.constant 0 : i32
    %c0_i32_2 = arith.constant 0 : i32
    return %c0_i32, %c0_i32_0, %c0_i32_1 : i32, i32, i32
  }
  func.func @transform_15(%arg0: i32) -> (i32, i32, i32) {
    %c0_i32 = arith.constant 0 : i32
    %c0_i32_0 = arith.constant 0 : i32
    %c0_i32_1 = arith.constant 0 : i32
    %c0_i32_2 = arith.constant 0 : i32
    return %c0_i32, %c0_i32_0, %c0_i32_1 : i32, i32, i32
  }
  func.func @transform_16(%arg0: i32) -> (i32, i32) {
    %c0_i32 = arith.constant 0 : i32
    %c0_i32_0 = arith.constant 0 : i32
    %c0_i32_1 = arith.constant 0 : i32
    return %c0_i32, %c0_i32_0 : i32, i32
  }
  func.func @transform_17(%arg0: i32) -> (i32, i32) {
    %c0_i32 = arith.constant 0 : i32
    %c0_i32_0 = arith.constant 0 : i32
    %c0_i32_1 = arith.constant 0 : i32
    return %c0_i32, %c0_i32_0 : i32, i32
  }
  func.func @transform_18(%arg0: i32) -> (i32, i32) {
    %c0_i32 = arith.constant 0 : i32
    %c0_i32_0 = arith.constant 0 : i32
    %c0_i32_1 = arith.constant 0 : i32
    return %c0_i32, %c0_i32_0 : i32, i32
  }
  func.func @transform_19(%arg0: i32) -> (i32, i32) {
    %c0_i32 = arith.constant 0 : i32
    %c0_i32_0 = arith.constant 0 : i32
    %c0_i32_1 = arith.constant 0 : i32
    return %c0_i32, %c0_i32_0 : i32, i32
  }
  func.func @transform_20(%arg0: i32) -> (i32, i32, i32) {
    %c0_i32 = arith.constant 0 : i32
    %c0_i32_0 = arith.constant 0 : i32
    %c0_i32_1 = arith.constant 0 : i32
    return %arg0, %c0_i32, %c0_i32_0 : i32, i32, i32
  }
}

</mosaic_0001>

<bundles_post_ra>
// kernel: tpu_custom_call.1
= control target key start
LH: loop header
LB: loop body
LE: loop exit
PB: predicated region body
PF: predicated region fallthrough
CT: control target
= control target key end

     0   :  { %s3217_s0 = inlined_call_operand.vmem [shape: f32[16,32], index: 0, kind: input, shape index: {}]   ;;  %s3218_s1 = inlined_call_operand.vmem [shape: f32[2,1,8], index: 1, kind: input, shape index: {}]   ;;  %s3219_s2 = inlined_call_operand.vmem [shape: f32[1,32], index: 2, kind: input, shape index: {}]   ;;  %s3220_s3 = inlined_call_operand.hbm [shape: f32[1,32], index: 3, kind: input, shape index: {}]   ;;  %s3221_s4 = inlined_call_operand.vmem [shape: bf16[2,32,96], index: 4, kind: input, shape index: {}]   ;;  %s3222_s5 = inlined_call_operand.vmem [shape: f32[2,1,96], index: 5, kind: input, shape index: {}]   ;;  %s3223_s6 = inlined_call_operand.vmem [shape: bf16[2,32,32], index: 6, kind: input, shape index: {}]   ;;  %s3224_s7 = inlined_call_operand.vmem [shape: f32[2,1,32], index: 7, kind: input, shape index: {}]   ;;  %s3225_s8 = inlined_call_operand.hbm [shape: f32[2,1,32], index: 8, kind: input, shape index: {}]   ;;  %s3226_s9 = inlined_call_operand.hbm [shape: f32[2,1,32], index: 9, kind: input, shape index: {}]   ;;  %s3227_s10 = inlined_call_operand.vmem [shape: bf16[2,32,64], index: 10, kind: input, shape index: {}]   ;;  %s3228_s11 = inlined_call_operand.vmem [shape: f32[2,1,64], index: 11, kind: input, shape index: {}]   ;;  %s3229_s12 = inlined_call_operand.vmem [shape: bf16[2,64,32], index: 12, kind: input, shape index: {}]   ;;  %s3230_s13 = inlined_call_operand.vmem [shape: f32[2,1,32], index: 13, kind: input, shape index: {}]   ;;  %s3231_s14 = inlined_call_operand.vmem [shape: f32[2,1,32], index: 14, kind: input, shape index: {}]   ;;  %s3232_s15 = inlined_call_operand.hbm [shape: f32[2,1,32], index: 15, kind: input, shape index: {}]   ;;  %s3233_s16 = inlined_call_operand.hbm [shape: bf16[32,32], index: 16, kind: input, shape index: {}]   ;;  %s3234_s17 = inlined_call_operand.vmem [shape: f32[1,32], index: 17, kind: input, shape index: {}]   ;;  %s3235_s18 = inlined_call_operand.vmem [shape: bf16[32,7], index: 18, kind: input, shape index: {}]   ;;  %s3236_s19 = inlined_call_operand.vmem [shape: f32[1,7], index: 19, kind: input, shape index: {}]   ;;  %s3237_s20 = inlined_call_operand.hbm [shape: f32[2,1,7], index: 20, kind: output, shape index: {}]  }
   0x1   :  { %3251 = sst [smem:[#allocation23_spill]] %s3217_s0 }
   0x2   :  { %3252 = sst [smem:[#allocation24_spill]] %s3218_s1 }
   0x3   :  { %3253 = sst [smem:[#allocation25_spill]] %s3219_s2 }
   0x4   :  { %3254 = sst [smem:[#allocation26_spill]] %s3220_s3 }
   0x5   :  { %3255 = sst [smem:[#allocation27_spill]] %s3221_s4 }
   0x6   :  { %3256 = sst [smem:[#allocation28_spill]] %s3225_s8 }
   0x7   :  { %3257 = sst [smem:[#allocation29_spill]] %s3232_s15 }
   0x8   :  { %3258 = sst [smem:[#allocation30_spill]] %s3234_s17 }
   0x9   :  { %3259 = sst [smem:[#allocation31_spill]] %s3236_s19 }
   0xa   :  { %3260 = sst [smem:[#allocation32_spill]] %s3237_s20 }
   0xb   :  { %25 = vsyncpa [#allocation3], 0 }
   0xc   :  { %26 = vsyncpa [#allocation6], 0 }
   0xd   :  { %27 = vsyncpa [#allocation9], 0 }
   0xe   :  { %28 = vsyncpa [#allocation4], 0 }
   0xf   :  { %30 = vsyncpa [#allocation4 + $0x1], 0  ;;  %s2785_s1 = smov 0   ;;  %s2787_s22 = smov 0  }
  0x10   :  { %s2789_s23 = smov 0   ;;  %s2791_s24 = smov 0  }
  0x11 LB: > { %3261 = sst [smem:[#allocation16_spill]] %s2648_s1  ;;  %s2806_s2 = sadd.s32 4294967295, %s2660_s24   ;;  %s2660_s24 = sphi %s2791_s24, %s3290_s24   ;;  %s2656_s23 = sphi %s2789_s23, %s3292_s23   ;;  %s2652_s22 = sphi %s2787_s22, %s3294_s22   ;;  %s2648_s1 = sphi %s2785_s1, %s3293_s1  }
  0x12   : > { %3262 = sst [smem:[#allocation17_spill]] %s2656_s23  ;;  %s2076_s25 = sadd.s32 4294967294, %s2660_s24  }
  0x13   : > { %3263 = sst [smem:[#allocation18_spill]] %s2660_s24  ;;  %s2810_s3 = sadd.s32 1, %s2660_s24  }
  0x14   : > { %3264 = sst [smem:[#allocation19_spill]] %s2810_s3  ;;  %s473_s26 = sadd.s32 1, %s2656_s23 }
  0x15   : > { %s470_s27 = ssub.s32 %s2660_s24, %s2810_s3  ;;  %p483_p0 = scmp.ne.s32.totalorder %s2656_s23, %s2652_s22 }
  0x16   : > { %p471_p1 = scmp.eq.s32.totalorder %s470_s27, 0  ;;  %p484_p2 = scmp.eq.s32.totalorder %s2806_s2, 1 }
  0x17   : > { %p489_p3 = scmp.ne.s32.totalorder %s2652_s22, %s2648_s1  ;;  %p490_p4 = scmp.eq.s32.totalorder %s2076_s25, 1 }
  0x18   : > { %s2821_s28 = scalar_select %p471_p1, %s2656_s23, %s473_s26  }
  0x19   : > { %p2823_p5 = por %p484_p2, %p483_p0  ;;  %p2827_p6 = por %p490_p4, %p489_p3 }
  0x1a   : > { %3265 = sst [smem:[#allocation20_spill]] %s2821_s28  ;;  %p2077_p7 = scmp.ge.s32.totalorder %s2660_s24, 1 }
  0x1b   : > { %s3266_s4 = scalar_select %p2823_p5, 1, 0 }
  0x1c   : > { %s3268_s29 = scalar_select %p2827_p6, 1, 0 }
  0x1d   : > { %3267 = sst [smem:[#allocation21_spill]] %s3266_s4  ;;  %p497_p8 = scmp.lt.s32.totalorder %s2660_s24, 3 }
  0x1e   : > { %3269 = sst [smem:[#allocation22_spill]] %s3268_s29  ;;  %p2306_p9 = scmp.eq.s32.totalorder %s2806_s2, 0 }
  0x1f   : > { %p2834_p10 = pnand %p2077_p7, %p497_p8  ;;  %s3271_s8 = sld [smem:[#allocation28_spill]] }
  0x20   : > { %s2662_s26 = smov [#allocation5]   ;;  %s3273_s15 = sld [smem:[#allocation29_spill]] }
  0x21   : > { %p2286_p11 = pneg %p2834_p10  ;;  %s537_s27 = sshll.u32 %s2662_s26, 4  ;;  %s538_s27 = int_to_ptr.vmem [resolvable:$true] %s537_s27 }
  0x22   : > { %s2663_s0 = smov 16   ;;  %s2664_s21 = smov 1  }
  0x23   : > { %p2845_p12 = pnand %p2306_p9, %p2286_p11  ;;  %s3274_s4 = sld [smem:[#allocation26_spill]] }
  0x24   : > { %s2666_s20 = smov [#allocation2]   ;;  %s2670_s23 = smov 4  }
  0x25   : > { %s535_s25 = sshll.u32 %s3271_s8, 4  ;;  %s2665_s8 = smov [#allocation8]   ;;  %s536_s25 = int_to_ptr.hbm [resolvable:$true] %s535_s25 }
  0x26   : > { %s578_s29 = sshll.u32 %s3273_s15, 4  ;;  %s580_s26 = sshll.u32 %s2665_s8, 4  ;;  %s579_s29 = int_to_ptr.hbm [resolvable:$true] %s578_s29  ;;  %s581_s26 = int_to_ptr.vmem [resolvable:$true] %s580_s26 }
  0x27   : > { %2292 = dma.hbm_to_vmem [thread:$0]  (!%p2845_p12), %s536_s25, 32, %s538_s27, [#allocation6], %s2663_s0, %s2663_s0, %s2664_s21  }
  0x28   : > { %2298 = dma.hbm_to_vmem [thread:$0]  (!%p2845_p12), %s579_s29, 32, %s581_s26, [#allocation9], %s2663_s0, %s2663_s0, %s2664_s21  }
  0x29   : > { %s512_s19 = sshll.u32 %s3274_s4, 4  ;;  %s549_s15 = sshll.u32 %s3226_s9, 4  ;;  %s513_s19 = int_to_ptr.hbm [resolvable:$true] %s512_s19  ;;  %s550_s15 = int_to_ptr.hbm [resolvable:$true] %s549_s15 }
  0x2a   : > { %s514_s17 = sshll.u32 %s2666_s20, 4  ;;  %s2667_s8 = smov [#allocation7]   ;;  %s515_s17 = int_to_ptr.vmem [resolvable:$true] %s514_s17 }
  0x2b   : > { %2289 = dma.hbm_to_vmem [thread:$0]  (!%p2845_p12), %s513_s19, 16, %s515_s17, [#allocation3]  }
  0x2c   : > { %s551_s25 = sshll.u32 %s2667_s8, 4  ;;  %s592_s4 = sshll.u32 %s3233_s16, 4  ;;  %s552_s25 = int_to_ptr.vmem [resolvable:$true] %s551_s25  ;;  %s593_s4 = int_to_ptr.hbm [resolvable:$true] %s592_s4 }
  0x2d   : > { %2295 = dma.hbm_to_vmem [thread:$0]  (!%p2845_p12), %s550_s15, 32, %s552_s25, [#allocation6], %s2663_s0, %s2663_s0, %s2664_s21  }
  0x2e   : > { %s2668_s29 = smov [#allocation10]   ;;  %s2669_s26 = smov 64  }
  0x2f   : > { %s594_s27 = sshll.u32 %s2668_s29, 4  ;;  %632 = sbr.rel (%p2834_p10) target bundleno = 4579 (0x11e3), region = 100  ;;  %s595_s27 = int_to_ptr.vmem [resolvable:$true] %s594_s27 }
  0x30   : > { %2301 = dma.hbm_to_vmem [thread:$0]  (!%p2845_p12), %s593_s4, 256, %s595_s27, [#allocation9], %s2669_s26, %s2669_s26, %s2670_s23  }
  0x34   : > { %2631 = dma.done.wait (%p2306_p9), [#allocation3], 16  }
  0x35   : > { %2633 = vsyncadd (%p2306_p9), [#allocation3], 4294967280 }
  0x36   : > { %2635 = dma.done.wait (%p2306_p9), [#allocation6], 64  }
  0x37   : > { %2637 = vsyncadd (%p2306_p9), [#allocation6], 4294967232 }
  0x38   : > { %2639 = dma.done.wait (%p2306_p9), [#allocation9], 288  }
  0x39   : > { %2641 = vsyncadd (%p2306_p9), [#allocation9], 4294967008  ;;  %p712_p13 = scmp.lt.s32.totalorder %s2806_s2, 1  ;;  %s3275_s28 = sld [smem:[#allocation23_spill]]  ;;  %vm724_vm0 = vcmask 261120   ;;  %v2671_v2 = vmov 32.0  }
  0x3a   : > { %s3276_s3 = sld [smem:[#allocation24_spill]]  ;;  %2386 = vrcp.f32 %v2671_v2  ;;  %v2369_v28 = vld [vmem:[#allocation2] ss:$0 sm:$0xff]  ;;  %s2674_s0 = smov 112   ;;  %vm821_vm5 = vcmask 64512   ;;  %vm1018_vm6 = vcmask 1043456  }
  0x3b   : > { %s2887_s15 = scalar_select %p712_p13, %s2806_s2, 1  ;;  %v2370_v32 = vld [vmem:[%s3222_s5] ss:$0 sm:$0xff] }
  0x3c   : > { %s3277_s24 = sld [smem:[#allocation27_spill]]  ;;  %s2675_s21 = smov 96  }
  0x3d   : > { %s2090_s17 = sshll.u32 %s2887_s15, 3  ;;  %s3249_s29 = smov 16  }
  0x3f   : > { %s715_s30 = scalar_lea.vmem %s3275_s28, %s2090_s17  ;;  %s3279_s17 = sld [smem:[#allocation25_spill]] }
  0x40   : > { %s718_s8 = scalar_lea.vmem %s3276_s3, %s2887_s15  ;;  %v721_v0 = vld [vmem:[%s715_s30] sm:$0xff]  ;;  %v2387_v3 = vpop.eup %2386  ;;  %s2672_s28 = smov 104  }
  0x41   : > { %v725_v1 = vsel %vm724_vm0, %v721_v0, 0.0  ;;  %v729_v4 = vmul.f32 32.0, %v2387_v3  ;;  %vm733_vm1 = vweird.f32 %v2387_v3  ;;  %s2673_s30 = smov 120   ;;  %v2949_v59 = vld [vmem:[%s718_s8] ss:$0 sm:$0xff]  ;;  %s2677_s15 = smov 8  }
  0x42   : > { %726 = vadd.xlane.f32.xlu0 %v725_v1  ;;  %s3278_s4 = smov %s3277_s24  ;;  %v2241_v14 = vld [vmem:[%s3277_s24 + $0x8] sm:$0xff]  ;;  %s2676_s24 = smov 64  }
  0x43   : > { %v730_v5 = vsub.f32 1.0, %v729_v4  ;;  %792 = vmatpush.bf16.msra.mxu0 %v2241_v14  ;;  %v2240_v15 = vld [vmem:[%s3278_s4] sm:$0xff]  ;;  %s3250_s8 = smov 24  }
  0x45   : > { %v731_v6 = vmul.f32 %v2387_v3, %v730_v5  ;;  %v2368_v25 = vld [vmem:[%s3279_s17] ss:$0 sm:$0xff]  ;;  %s3285_s17 = sld [smem:[#allocation31_spill]] }
  0x47   : > { %v732_v7 = vadd.f32 %v2387_v3, %v731_v6  ;;  %793 = vmatpush.bf16.msra.mxu0 %v2240_v15 }
  0x49   : > { %v2898_v8 = vsel %vm733_vm1, %v2387_v3, %v732_v7 }
  0xb5   : > { %v727_v9 = vpop.xlane.xlu0 %726 }
  0xb6   : > { %v735_v10 = vmul.f32 %v2898_v8, %v727_v9 }
  0xb8   : > { %v736_v11 = vsub.f32 %v721_v0, %v735_v10 }
  0xba   : > { %v737_v12 = vmul.f32 %v736_v11, %v736_v11 }
  0xbc   : > { %v738_v13 = vsel %vm724_vm0, %v737_v12, 0.0 }
  0xbd   : > { %739 = vadd.xlane.f32.xlu0 %v738_v13 }
 0x130   : > { %v740_v16 = vpop.xlane.xlu0 %739 }
 0x131   : > { %v741_v17 = vmul.f32 %v740_v16, %v2898_v8 }
 0x133   : > { %v742_v18 = vadd.f32 1e-12, %v741_v17 }
 0x135   : > { %2388 = vrsqrt.f32 %v742_v18  ;;  %vm749_vm3 = vweird.f32 %v742_v18 }
 0x13b   : > { %v2389_v19 = vpop.eup %2388 }
 0x13c   : > { %v744_v20 = vmul.f32 %v2389_v19, %v742_v18  ;;  %vm750_vm2 = vweird.f32 %v2389_v19 }
 0x13d   : > { %vm751_vm4 = vmor %vm749_vm3, %vm750_vm2 }
 0x13e   : > { %v745_v21 = vmul.f32 %v2389_v19, %v744_v20 }
 0x140   : > { %v746_v22 = vmul.f32 0.5, %v745_v21 }
 0x142   : > { %v747_v23 = vsub.f32 1.5, %v746_v22 }
 0x144   : > { %v748_v24 = vmul.f32 %v2389_v19, %v747_v23 }
 0x146   : > { %v752_v26 = vsel %vm751_vm4, %v2389_v19, %v748_v24 }
 0x147   : > { %v753_v27 = vmul.f32 %v752_v26, %v736_v11 }
 0x149   : > { %v757_v29 = vmul.f32 %v2368_v25, %v753_v27 }
 0x14b   : > { %v2912_v30 = vadd.f32 %v2369_v28, %v757_v29 }
 0x14d   : > { %v762_v31 = vpack.c.bf16 %v2912_v30, %v2912_v30 }
 0x14f   : > { %2099 = vmatmul.msk.bf16.vlgmr.msra.gmra.mxu0 %vm724_vm0, %v762_v31 }
 0x1cc   : > { %v795_v33 = vpop.f32.mrf.mxu0 }
 0x1cd   : > { %v796_v34 = vadd.f32 %v2370_v32, %v795_v33 }
 0x1cf   : > { %806 = vrot.lane.b32.xlu2 %v796_v34, %s2672_s28  ;;  %800 = vrot.lane.b32.xlu1 %v796_v34, %s2673_s30  ;;  %v809_v44 = vpack.c.bf16 %v796_v34, %v796_v34 }
 0x1d1   : > { %v817_v47 = vunpack.c.l.b16 %v809_v44 }
 0x1d3   : > { %v2930_v50 = vpack.c.b16 %v817_v47, %v817_v47 }
 0x1d4   : > { %v797_v35 = vpop.f32.mrf.mxu0 }
 0x1d7   : > { %803 = vrot.lane.b32.xlu1 %v796_v34, %s2674_s0 }
 0x229   : > { %v807_v36 = vpop.permute.xlu2 %806 }
 0x22a   : > { %v812_v37 = vpack.c.bf16 %v807_v36, %v807_v36 }
 0x22c   : > { %v890_v38 = vunpack.c.l.b16 %v812_v37 }
 0x22e   : > { %v2923_v39 = vpack.c.b16 %v890_v38, %v890_v38 }
 0x230   : > { %892 = vrot.lane.b32.xlu1 %v2923_v39, %s2675_s21 }
 0x241   : > { %v801_v40 = vpop.permute.xlu1 %800 }
 0x242   : > { %v810_v41 = vpack.c.bf16 %v801_v40, %v801_v40 }
 0x244   : > { %v842_v42 = vunpack.c.l.b16 %v810_v41 }
 0x246   : > { %v843_v43 = vpack.c.b16 %v842_v42, %v842_v42 }
 0x248   : > { %844 = vrot.lane.b32.xlu2 %v843_v43, %s2675_s21 }
 0x249   : > { %v804_v45 = vpop.permute.xlu1 %803 }
 0x24a   : > { %v811_v46 = vpack.c.bf16 %v804_v45, %v804_v45 }
 0x24c   : > { %v866_v48 = vunpack.c.l.b16 %v811_v46 }
 0x24e   : > { %v2928_v49 = vpack.c.b16 %v866_v48, %v866_v48 }
 0x250   : > { %868 = vrot.lane.b32.xlu0 %v2928_v49, %s2675_s21  ;;  %819 = vrot.lane.b32.xlu2 %v2930_v50, %s2675_s21 }
 0x2a2   : > { %v845_v51 = vpop.permute.xlu2 %844  ;;  %v893_v52 = vpop.permute.xlu1 %892 }
 0x2a3   : > { %v850_v53 = vsel %vm821_vm5, %v845_v51, 0  ;;  %v898_v54 = vsel %vm821_vm5, %v893_v52, 0 }
 0x2a4   : > { %859 = vmatpush.bf16.xpose.msra.mxu2 %v850_v53  ;;  %907 = vmatpush.bf16.xpose.msrb.mxu0 %v898_v54 }
 0x2aa   : > { %v820_v55 = vpop.permute.xlu2 %819 }
 0x2ab   : > { %2101 = vmatmul.msk.bf16.vlgmr.msra.gmra.mxu2 %vm821_vm5, %v810_v41  ;;  %2103 = vmatmul.msk.bf16.vlgmr.msrb.gmra.mxu0 %vm821_vm5, %v812_v37  ;;  %v826_v56 = vsel %vm821_vm5, %v820_v55, 0 }
 0x2ac   : > { %835 = vmatpush.bf16.xpose.msra.mxu1 %v826_v56 }
 0x2b3   : > { %2100 = vmatmul.msk.bf16.vlgmr.msra.gmra.mxu1 %vm821_vm5, %v809_v44 }
 0x2c2   : > { %v869_v57 = vpop.permute.xlu0 %868 }
 0x2c3   : > { %v874_v58 = vsel %vm821_vm5, %v869_v57, 0 }
 0x2c4   : > { %883 = vmatpush.bf16.xpose.msra.mxu3 %v874_v58 }
 0x2cb   : > { %2102 = vmatmul.msk.bf16.vlgmr.msra.gmra.mxu3 %vm821_vm5, %v811_v46 }
 0x328   : > { %v909_v60 = vpop.f32.mrf.mxu0 }
 0x329   : > { %v910_v61 = vadd.f32 %v2949_v59, %v909_v60 }
 0x32b   : > { %v922_v62 = vsel %vm821_vm5, %v910_v61, -inf }
 0x32c   : > { %923 = vmax.xlane.f32.xlu0 %v922_v62 }
 0x32e   : > { %v861_v63 = vpop.f32.mrf.mxu2 }
 0x32f   : > { %v862_v0 = vadd.f32 %v2949_v59, %v861_v63 }
 0x330   : > { %v837_v1 = vpop.f32.mrf.mxu1  ;;  %v911_v2 = vpop.f32.mrf.mxu0 }
 0x331   : > { %v916_v3 = vsel %vm821_vm5, %v862_v0, -inf  ;;  %v838_v10 = vadd.f32 %v2949_v59, %v837_v1 }
 0x332   : > { %917 = vmax.xlane.f32.xlu1 %v916_v3 }
 0x333   : > { %v913_v12 = vsel %vm821_vm5, %v838_v10, -inf }
 0x336   : > { %v863_v4 = vpop.f32.mrf.mxu2 }
 0x338   : > { %v839_v5 = vpop.f32.mrf.mxu1 }
 0x340   : > { %1035 = vrot.lane.b32.xlu0 %v843_v43, %s2676_s24 }
 0x34e   : > { %v885_v6 = vpop.f32.mrf.mxu3 }
 0x34f   : > { %v886_v7 = vadd.f32 %v2949_v59, %v885_v6 }
 0x351   : > { %v919_v9 = vsel %vm821_vm5, %v886_v7, -inf }
 0x352   : > { %920 = vmax.xlane.f32.xlu2 %v919_v9 }
 0x356   : > { %v887_v11 = vpop.f32.mrf.mxu3 }
 0x35a   : > { %914 = vmax.xlane.f32.xlu2 %v913_v12 }
 0x39f   : > { %v924_v13 = vpop.xlane.xlu0 %923 }
 0x3a0   : > { %v928_v14 = vsub.f32 %v910_v61, %v924_v13 }
 0x3a2   : > { %v935_v15 = vmul.f32 1.442695, %v928_v14 }
 0x3a4   : > { %2390 = vpow2.f32 %v935_v15 }
 0x3a5   : > { %v918_v16 = vpop.xlane.xlu1 %917 }
 0x3a6   : > { %v926_v17 = vsub.f32 %v862_v0, %v918_v16 }
 0x3a8   : > { %v931_v18 = vmul.f32 1.442695, %v926_v17 }
 0x3aa   : > { %v2960_v19 = vpop.eup %2390  ;;  %2392 = vpow2.f32 %v931_v18 }
 0x3ab   : > { %v946_v20 = vsel %vm821_vm5, %v2960_v19, 0.0 }
 0x3ac   : > { %947 = vadd.xlane.f32.xlu1 %v946_v20 }
 0x3b0   : > { %v2393_v21 = vpop.eup %2392 }
 0x3b1   : > { %v940_v24 = vsel %vm821_vm5, %v2393_v21, 0.0 }
 0x3b2   : > { %v1036_v22 = vpop.permute.xlu0 %1035 }
 0x3b3   : > { %v1041_v23 = vsel %vm1018_vm6, %v1036_v22, 0 }
 0x3b4   : > { %1050 = vmatpush.bf16.msrb.mxu2 %v1041_v23  ;;  %941 = vadd.xlane.f32.xlu1 %v940_v24 }
 0x3c5   : > { %v921_v25 = vpop.xlane.xlu2 %920 }
 0x3c6   : > { %v927_v26 = vsub.f32 %v886_v7, %v921_v25 }
 0x3c8   : > { %v933_v27 = vmul.f32 1.442695, %v927_v26 }
 0x3ca   : > { %2394 = vpow2.f32 %v933_v27 }
 0x3cd   : > { %1077 = vrot.lane.b32.xlu1 %v2923_v39, %s2676_s24  ;;  %v915_v28 = vpop.xlane.xlu2 %914 }
 0x3ce   : > { %v925_v29 = vsub.f32 %v838_v10, %v915_v28 }
 0x3d0   : > { %v2968_v31 = vpop.eup %2394  ;;  %v929_v32 = vmul.f32 1.442695, %v925_v29 }
 0x3d1   : > { %v943_v33 = vsel %vm821_vm5, %v2968_v31, 0.0 }
 0x3d2   : > { %2396 = vpow2.f32 %v929_v32  ;;  %944 = vadd.xlane.f32.xlu2 %v943_v33 }
 0x3d8   : > { %v2972_v34 = vpop.eup %2396 }
 0x3d9   : > { %v937_v35 = vsel %vm821_vm5, %v2972_v34, 0.0 }
 0x3da   : > { %938 = vadd.xlane.f32.xlu0 %v937_v35 }
 0x3ea   : > { %1056 = vrot.lane.b32.xlu2 %v2928_v49, %s2676_s24 }
 0x3f2   : > { %1013 = vrot.lane.b32.xlu2 %v2930_v50, %s2676_s24 }
 0x41f   : > { %v948_v36 = vpop.xlane.xlu1 %947 }
 0x420   : > { %2398 = vrcp.f32 %v948_v36  ;;  %v1002_v49 = vand.u32 2147483648, %v948_v36  ;;  %vm996_vm10 = vweird.f32 %v948_v36  ;;  %v1000_v50 = vand.u32 2147483647, %v948_v36 }
 0x422   : > { %v1003_v56 = vor.u32 1.1754944e-38, %v1002_v49  ;;  %vm1001_vm14 = vcmp.eq.f32.partialorder %v1000_v50, 8.507059e+37 }
 0x426   : > { %v2399_v37 = vpop.eup %2398 }
 0x427   : > { %v942_v38 = vpop.xlane.xlu1 %941  ;;  %v992_v39 = vmul.f32 %v2399_v37, %v948_v36  ;;  %vm997_vm8 = vweird.f32 %v2399_v37 }
 0x428   : > { %2400 = vrcp.f32 %v942_v38  ;;  %v974_v45 = vand.u32 2147483648, %v942_v38  ;;  %v972_v47 = vand.u32 2147483647, %v942_v38  ;;  %vm968_vm9 = vweird.f32 %v942_v38  ;;  %vm998_vm12 = vmor %vm996_vm10, %vm997_vm8 }
 0x429   : > { %v993_v40 = vsub.f32 1.0, %v992_v39  ;;  %vm1111_vm10 = vcmask 130048  }
 0x42a   : > { %v975_v52 = vor.u32 1.1754944e-38, %v974_v45  ;;  %vm973_vm13 = vcmp.eq.f32.partialorder %v972_v47, 8.507059e+37 }
 0x42b   : > { %v994_v43 = vmul.f32 %v2399_v37, %v993_v40 }
 0x42d   : > { %v995_v48 = vadd.f32 %v2399_v37, %v994_v43 }
 0x42e   : > { %v2401_v41 = vpop.eup %2400 }
 0x42f   : > { %v964_v42 = vmul.f32 %v2401_v41, %v942_v38  ;;  %vm969_vm7 = vweird.f32 %v2401_v41  ;;  %v999_v54 = vsel %vm998_vm12, %v2399_v37, %v995_v48 }
 0x430   : > { %vm970_vm11 = vmor %vm968_vm9, %vm969_vm7  ;;  %v1004_v58 = vsel %vm1001_vm14, %v1003_v56, %v999_v54 }
 0x431   : > { %v965_v44 = vsub.f32 1.0, %v964_v42  ;;  %v1008_v61 = vmul.f32 %v2960_v19, %v1004_v58  ;;  %v2242_v42 = vld [vmem:[%s3223_s6] sm:$0xff] }
 0x433   : > { %v966_v46 = vmul.f32 %v2401_v41, %v965_v44  ;;  %v1012_v0 = vpack.c.bf16 %v1008_v61, %v1008_v61 }
 0x435   : > { %v967_v51 = vadd.f32 %v2401_v41, %v966_v46 }
 0x437   : > { %v971_v53 = vsel %vm970_vm11, %v2401_v41, %v967_v51  ;;  %v2243_v41 = vld [vmem:[%s3223_s6 + $0x8] sm:$0xff]  ;;  %vm1113_vm11 = vcmask 195584   ;;  %v2371_v51 = vld [vmem:[%s3224_s7] ss:$0 sm:$0xff] }
 0x438   : > { %v976_v55 = vsel %vm973_vm13, %v975_v52, %v971_v53 }
 0x439   : > { %v1006_v57 = vmul.f32 %v2393_v21, %v976_v55 }
 0x43b   : > { %v1010_v60 = vpack.c.bf16 %v1006_v57, %v1006_v57 }
 0x43d   : > { %2105 = vmatmul.msk.bf16.vlgmr.msrb.gmra.mxu2 %vm821_vm5, %v1010_v60 }
 0x43f   : > { %v1078_v62 = vpop.permute.xlu1 %1077 }
 0x440   : > { %v1083_v63 = vsel %vm1018_vm6, %v1078_v62, 0  ;;  %v2245_v62 = vld [vmem:[%s3227_s10 + $0x8] sm:$0xff] }
 0x441   : > { %1092 = vmatpush.bf16.msra.mxu0 %v1083_v63  ;;  %1215 = vmatpush.bf16.msra.mxu2 %v2245_v62 }
 0x444   : > { %2107 = vmatmul.msk.bf16.vlgmr.msra.gmra.mxu0 %vm821_vm5, %v1012_v0 }
 0x445   : > { %v945_v1 = vpop.xlane.xlu2 %944 }
 0x446   : > { %2402 = vrcp.f32 %v945_v1  ;;  %v988_v9 = vand.u32 2147483648, %v945_v1  ;;  %v986_v11 = vand.u32 2147483647, %v945_v1  ;;  %vm982_vm1 = vweird.f32 %v945_v1 }
 0x448   : > { %v989_v14 = vor.u32 1.1754944e-38, %v988_v9  ;;  %vm987_vm3 = vcmp.eq.f32.partialorder %v986_v11, 8.507059e+37  ;;  %v2372_v9 = vld [vmem:[#allocation5] ss:$0 sm:$0xff]  ;;  %v2373_v11 = vld [vmem:[#allocation7] ss:$0 sm:$0xff] }
 0x44c   : > { %v2403_v2 = vpop.eup %2402 }
 0x44d   : > { %v978_v3 = vmul.f32 %v2403_v2, %v945_v1  ;;  %v939_v4 = vpop.xlane.xlu0 %938  ;;  %v1057_v5 = vpop.permute.xlu2 %1056  ;;  %vm983_vm15 = vweird.f32 %v2403_v2 }
 0x44e   : > { %2404 = vrcp.f32 %v939_v4  ;;  %v1062_v7 = vsel %vm1018_vm6, %v1057_v5, 0  ;;  %vm984_vm2 = vmor %vm982_vm1, %vm983_vm15  ;;  %v960_v22 = vand.u32 2147483648, %v939_v4  ;;  %v958_v24 = vand.u32 2147483647, %v939_v4 }
 0x44f   : > { %v979_v6 = vsub.f32 1.0, %v978_v3  ;;  %1071 = vmatpush.bf16.msrb.mxu3 %v1062_v7  ;;  %vm954_vm7 = vweird.f32 %v939_v4  ;;  %vm1268_vm15 = vcmask 523264  }
 0x450   : > { %v961_v27 = vor.u32 1.1754944e-38, %v960_v22  ;;  %vm959_vm9 = vcmp.eq.f32.partialorder %v958_v24, 8.507059e+37 }
 0x451   : > { %v980_v10 = vmul.f32 %v2403_v2, %v979_v6 }
 0x453   : > { %v981_v12 = vadd.f32 %v2403_v2, %v980_v10 }
 0x454   : > { %v2405_v13 = vpop.eup %2404 }
 0x455   : > { %v950_v15 = vmul.f32 %v2405_v13, %v939_v4  ;;  %v1014_v16 = vpop.permute.xlu2 %1013  ;;  %v985_v17 = vsel %vm984_vm2, %v2403_v2, %v981_v12  ;;  %vm955_vm4 = vweird.f32 %v2405_v13 }
 0x456   : > { %v1020_v18 = vsel %vm1018_vm6, %v1014_v16, 0  ;;  %v990_v19 = vsel %vm987_vm3, %v989_v14, %v985_v17  ;;  %vm956_vm8 = vmor %vm954_vm7, %vm955_vm4  ;;  %v2249_v16 = vld [vmem:[%s3229_s12 + $0x18] sm:$0xff]  ;;  %v2248_v17 = vld [vmem:[%s3229_s12 + $0x10] sm:$0xff] }
 0x457   : > { %v951_v20 = vsub.f32 1.0, %v950_v15  ;;  %1029 = vmatpush.bf16.msrb.mxu1 %v1020_v18  ;;  %v1007_v21 = vmul.f32 %v2968_v31, %v990_v19  ;;  %1276 = vmatpush.bf16.msra.mxu3 %v2249_v16  ;;  %v2247_v18 = vld [vmem:[%s3229_s12 + $0x8] sm:$0xff]  ;;  %v2246_v19 = vld [vmem:[%s3229_s12] sm:$0xff] }
 0x459   : > { %v952_v23 = vmul.f32 %v2405_v13, %v951_v20  ;;  %v1011_v25 = vpack.c.bf16 %v1007_v21, %v1007_v21  ;;  %v2374_v20 = vld [vmem:[%s3228_s11] ss:$0 sm:$0xff] }
 0x45b   : > { %v953_v26 = vadd.f32 %v2405_v13, %v952_v23  ;;  %2106 = vmatmul.msk.bf16.vlgmr.msrb.gmra.mxu3 %vm821_vm5, %v1011_v25  ;;  %1145 = vmatpush.bf16.msra.mxu1 %v2243_v41 }
 0x45c   : > { %1277 = vmatpush.bf16.msra.mxu3 %v2248_v17 }
 0x45d   : > { %v957_v28 = vsel %vm956_vm8, %v2405_v13, %v953_v26 }
 0x45e   : > { %v962_v29 = vsel %vm959_vm9, %v961_v27, %v957_v28 }
 0x45f   : > { %v1005_v32 = vmul.f32 %v2972_v34, %v962_v29  ;;  %1146 = vmatpush.bf16.msra.mxu1 %v2242_v42 }
 0x460   : > { %1278 = vmatpush.bf16.msra.mxu3 %v2247_v18 }
 0x461   : > { %v1009_v33 = vpack.c.bf16 %v1005_v32, %v1005_v32 }
 0x463   : > { %2104 = vmatmul.msk.bf16.vlgmr.msrb.gmra.mxu1 %vm821_vm5, %v1009_v33 }
 0x464   : > { %1279 = vmatpush.bf16.msra.mxu3 %v2246_v19 }
 0x4c0   : > { %v1052_v31 = vpop.f32.mrf.mxu2 }
 0x4c1   : > { %1099 = vrot.lane.b32.xlu1 %v1052_v31, %s2677_s15  ;;  %v1094_v35 = vpop.f32.mrf.mxu0 }
 0x4c8   : > { %v1054_v36 = vpop.f32.mrf.mxu2 }
 0x4c9   : > { %1107 = vrot.lane.b32.xlu1 %v1094_v35, %s3250_s8  ;;  %v1096_v37 = vpop.f32.mrf.mxu0  ;;  %v2375_v36 = vld [vmem:[%s3230_s13] ss:$0 sm:$0xff] }
 0x4de   : > { %v1073_v38 = vpop.f32.mrf.mxu3 }
 0x4df   : > { %1103 = vrot.lane.b32.xlu2 %v1073_v38, %s3249_s29 }
 0x4e0   : > { %v1031_v39 = vpop.f32.mrf.mxu1 }
 0x4e6   : > { %v1075_v40 = vpop.f32.mrf.mxu3 }
 0x4e8   : > { %v1033_v34 = vpop.f32.mrf.mxu1 }
 0x533   : > { %v1100_v43 = vpop.permute.xlu1 %1099 }
 0x534   : > { %v1110_v44 = vsel %vm821_vm5, %v1031_v39, %v1100_v43 }
 0x539   : > { %v1104_v45 = vpop.permute.xlu2 %1103 }
 0x53a   : > { %v1112_v46 = vsel %vm1111_vm10, %v1110_v44, %v1104_v45 }
 0x53b   : > { %v1108_v47 = vpop.permute.xlu1 %1107 }
 0x53c   : > { %v1114_v48 = vsel %vm1113_vm11, %v1112_v46, %v1108_v47  ;;  %v2251_v46 = vld [vmem:[%s3278_s4 + $0x18] sm:$0xff]  ;;  %v2250_v47 = vld [vmem:[%s3278_s4 + $0x10] sm:$0xff] }
 0x53d   : > { %v1115_v49 = vpack.c.bf16 %v1114_v48, %v1114_v48  ;;  %1350 = vmatpush.bf16.msrb.mxu0 %v2251_v46 }
 0x53f   : > { %2116 = vmatmul.msk.bf16.vlgmr.msra.gmra.mxu1 %vm724_vm0, %v1115_v49 }
 0x541   : > { %1351 = vmatpush.bf16.msrb.mxu0 %v2250_v47 }
 0x5bc   : > { %v1148_v50 = vpop.f32.mrf.mxu1 }
 0x5bd   : > { %v1149_v52 = vadd.f32 %v2371_v51, %v1148_v50 }
 0x5bf   : > { %v1152_v53 = vadd.f32 %v1149_v52, %v2912_v30  ;;  %v2244_v30 = vld [vmem:[%s3227_s10] sm:$0xff] }
 0x5c0   : > { %1216 = vmatpush.bf16.msra.mxu2 %v2244_v30 }
 0x5c1   : > { %v1155_v54 = vsel %vm724_vm0, %v1152_v53, 0.0 }
 0x5c2   : > { %1156 = vadd.xlane.f32.xlu2 %v1155_v54 }
 0x5c4   : > { %v1150_v55 = vpop.f32.mrf.mxu1 }
 0x635   : > { %v1157_v56 = vpop.xlane.xlu2 %1156 }
 0x636   : > { %v1158_v57 = vmul.f32 %v1157_v56, %v2898_v8 }
 0x638   : > { %v1159_v58 = vsub.f32 %v1152_v53, %v1158_v57  ;;  %v2376_v57 = vld [vmem:[%s3231_s14] ss:$0 sm:$0xff] }
 0x63a   : > { %v1160_v60 = vmul.f32 %v1159_v58, %v1159_v58 }
 0x63c   : > { %v1161_v61 = vsel %vm724_vm0, %v1160_v60, 0.0  ;;  %v2377_v60 = vld [vmem:[#allocation8] ss:$0 sm:$0xff] }
 0x63d   : > { %1162 = vadd.xlane.f32.xlu1 %v1161_v61 }
 0x6b0   : > { %v1163_v63 = vpop.xlane.xlu1 %1162 }
 0x6b1   : > { %v1164_v0 = vmul.f32 %v1163_v63, %v2898_v8 }
 0x6b3   : > { %v1165_v1 = vadd.f32 1e-12, %v1164_v0  ;;  %v2378_v0 = vld [vmem:[%s3222_s5 + $0x1] ss:$0 sm:$0xff] }
 0x6b5   : > { %2406 = vrsqrt.f32 %v1165_v1  ;;  %vm1172_vm13 = vweird.f32 %v1165_v1 }
 0x6bb   : > { %v2407_v2 = vpop.eup %2406 }
 0x6bc   : > { %v1167_v3 = vmul.f32 %v2407_v2, %v1165_v1  ;;  %vm1173_vm12 = vweird.f32 %v2407_v2 }
 0x6bd   : > { %vm1174_vm14 = vmor %vm1172_vm13, %vm1173_vm12 }
 0x6be   : > { %v1168_v4 = vmul.f32 %v2407_v2, %v1167_v3 }
 0x6c0   : > { %v1169_v5 = vmul.f32 0.5, %v1168_v4 }
 0x6c2   : > { %v1170_v6 = vsub.f32 1.5, %v1169_v5 }
 0x6c4   : > { %v1171_v7 = vmul.f32 %v2407_v2, %v1170_v6 }
 0x6c6   : > { %v1175_v10 = vsel %vm1174_vm14, %v2407_v2, %v1171_v7 }
 0x6c7   : > { %v1176_v12 = vmul.f32 %v1175_v10, %v1159_v58 }
 0x6c9   : > { %v1180_v13 = vmul.f32 %v2372_v9, %v1176_v12 }
 0x6cb   : > { %v1184_v14 = vadd.f32 %v2373_v11, %v1180_v13 }
 0x6cd   : > { %v1185_v15 = vpack.c.bf16 %v1184_v14, %v1184_v14 }
 0x6cf   : > { %2125 = vmatmul.msk.bf16.vlgmr.msra.gmra.mxu2 %vm724_vm0, %v1185_v15 }
 0x752   : > { %v1218_v21 = vpop.f32.mrf.mxu2 }
 0x753   : > { %v1219_v22 = vadd.f32 %v2374_v20, %v1218_v21 }
 0x755   : > { %v1223_v23 = vmul.f32 0.044715, %v1219_v22  ;;  %v1222_v32 = vmul.f32 0.5, %v1219_v22 }
 0x757   : > { %v1224_v24 = vmul.f32 %v1223_v23, %v1219_v22 }
 0x759   : > { %v1225_v25 = vmul.f32 %v1224_v24, %v1219_v22 }
 0x75a   : > { %v1220_v26 = vpop.f32.mrf.mxu2 }
 0x75b   : > { %v1226_v27 = vadd.f32 %v1225_v25, %v1219_v22 }
 0x75d   : > { %v1227_v28 = vmul.f32 0.7978846, %v1226_v27 }
 0x75f   : > { %2408 = vtanh.f32 %v1227_v28 }
 0x765   : > { %v2409_v29 = vpop.eup %2408 }
 0x766   : > { %v1229_v33 = vadd.f32 1.0, %v2409_v29 }
 0x768   : > { %v1230_v31 = vmul.f32 %v1229_v33, %v1222_v32 }
 0x76a   : > { %v1231_v35 = vpack.c.bf16 %v1230_v31, %v1230_v31 }
 0x76c   : > { %2142 = vmatmul.msk.bf16.vlgmr.msra.gmra.mxu3 %vm1268_vm15, %v1231_v35 }
 0x7ef   : > { %v1281_v37 = vpop.f32.mrf.mxu3 }
 0x7f0   : > { %v1282_v38 = vadd.f32 %v2375_v36, %v1281_v37 }
 0x7f2   : > { %v1285_v39 = vadd.f32 %v1282_v38, %v1184_v14 }
 0x7f4   : > { %v1288_v40 = vsel %vm724_vm0, %v1285_v39, 0.0 }
 0x7f5   : > { %1289 = vadd.xlane.f32.xlu0 %v1288_v40 }
 0x7f7   : > { %v1283_v34 = vpop.f32.mrf.mxu3 }
 0x868   : > { %v1290_v41 = vpop.xlane.xlu0 %1289 }
 0x869   : > { %v1291_v42 = vmul.f32 %v1290_v41, %v2898_v8 }
 0x86b   : > { %v1292_v43 = vsub.f32 %v1285_v39, %v1291_v42 }
 0x86d   : > { %v1293_v44 = vmul.f32 %v1292_v43, %v1292_v43 }
 0x86f   : > { %v1294_v45 = vsel %vm724_vm0, %v1293_v44, 0.0 }
 0x870   : > { %1295 = vadd.xlane.f32.xlu0 %v1294_v45 }
 0x8e3   : > { %v1296_v48 = vpop.xlane.xlu0 %1295 }
 0x8e4   : > { %v1297_v49 = vmul.f32 %v1296_v48, %v2898_v8 }
 0x8e6   : > { %v1298_v51 = vadd.f32 1e-12, %v1297_v49 }
 0x8e8   : > { %2410 = vrsqrt.f32 %v1298_v51  ;;  %vm1305_vm2 = vweird.f32 %v1298_v51 }
 0x8ee   : > { %v2411_v50 = vpop.eup %2410 }
 0x8ef   : > { %v1300_v52 = vmul.f32 %v2411_v50, %v1298_v51  ;;  %vm1306_vm1 = vweird.f32 %v2411_v50 }
 0x8f0   : > { %vm1307_vm3 = vmor %vm1305_vm2, %vm1306_vm1 }
 0x8f1   : > { %v1301_v53 = vmul.f32 %v2411_v50, %v1300_v52 }
 0x8f3   : > { %v1302_v54 = vmul.f32 0.5, %v1301_v53 }
 0x8f5   : > { %v1303_v55 = vsub.f32 1.5, %v1302_v54 }
 0x8f7   : > { %v1304_v56 = vmul.f32 %v2411_v50, %v1303_v55 }
 0x8f9   : > { %v1308_v58 = vsel %vm1307_vm3, %v2411_v50, %v1304_v56 }
 0x8fa   : > { %v1309_v61 = vmul.f32 %v1308_v58, %v1292_v43 }
 0x8fc   : > { %v1313_v62 = vmul.f32 %v2376_v57, %v1309_v61 }
 0x8fe   : > { %v3050_v30 = vadd.f32 %v2377_v60, %v1313_v62 }
 0x900   : > { %v1318_v63 = vpack.c.bf16 %v3050_v30, %v3050_v30 }
 0x902   : > { %2156 = vmatmul.msk.bf16.vlgmr.msrb.gmra.mxu0 %vm724_vm0, %v1318_v63 }
 0x97f   : > { %v1353_v1 = vpop.f32.mrf.mxu0 }
 0x980   : > { %v1354_v2 = vadd.f32 %v2378_v0, %v1353_v1 }
 0x982   : > { %1364 = vrot.lane.b32.xlu1 %v1354_v2, %s2672_s28  ;;  %1361 = vrot.lane.b32.xlu2 %v1354_v2, %s2674_s0  ;;  %v1367_v3 = vpack.c.bf16 %v1354_v2, %v1354_v2  ;;  %s3280_s28 = smov 24  }
 0x983   : > { %1358 = vrot.lane.b32.xlu0 %v1354_v2, %s2673_s30  ;;  %s3281_s30 = smov 16  }
 0x984   : > { %v1372_v4 = vunpack.c.l.b16 %v1367_v3 }
 0x986   : > { %v3061_v6 = vpack.c.b16 %v1372_v4, %v1372_v4 }
 0x987   : > { %v1355_v5 = vpop.f32.mrf.mxu0 }
 0x98a   : > { %1374 = vrot.lane.b32.xlu1 %v3061_v6, %s2675_s21 }
 0x9dc   : > { %v1362_v12 = vpop.permute.xlu2 %1361 }
 0x9dd   : > { %v1369_v16 = vpack.c.bf16 %v1362_v12, %v1362_v12 }
 0x9df   : > { %v1420_v20 = vunpack.c.l.b16 %v1369_v16 }
 0x9e1   : > { %v1421_v21 = vpack.c.b16 %v1420_v20, %v1420_v20 }
 0x9f4   : > { %v1365_v7 = vpop.permute.xlu1 %1364 }
 0x9f5   : > { %v1370_v9 = vpack.c.bf16 %v1365_v7, %v1365_v7  ;;  %v1359_v10 = vpop.permute.xlu0 %1358 }
 0x9f6   : > { %v1368_v11 = vpack.c.bf16 %v1359_v10, %v1359_v10 }
 0x9f7   : > { %v1444_v13 = vunpack.c.l.b16 %v1370_v9 }
 0x9f8   : > { %v1396_v14 = vunpack.c.l.b16 %v1368_v11 }
 0x9f9   : > { %v1445_v15 = vpack.c.b16 %v1444_v13, %v1444_v13 }
 0x9fa   : > { %v3065_v17 = vpack.c.b16 %v1396_v14, %v1396_v14 }
 0x9fb   : > { %1446 = vrot.lane.b32.xlu2 %v1445_v15, %s2675_s21 }
 0x9fc   : > { %1398 = vrot.lane.b32.xlu0 %v3065_v17, %s2675_s21  ;;  %v1375_v18 = vpop.permute.xlu1 %1374 }
 0x9fd   : > { %v1380_v19 = vsel %vm821_vm5, %v1375_v18, 0 }
 0x9fe   : > { %1389 = vmatpush.bf16.xpose.msrb.mxu1 %v1380_v19 }
 0xa04   : > { %1422 = vrot.lane.b32.xlu0 %v1421_v21, %s2675_s21 }
 0xa05   : > { %2157 = vmatmul.msk.bf16.vlgmr.msrb.gmra.mxu1 %vm821_vm5, %v1367_v3 }
 0xa55   : > { %v1447_v22 = vpop.permute.xlu2 %1446 }
 0xa56   : > { %v1452_v23 = vsel %vm821_vm5, %v1447_v22, 0 }
 0xa57   : > { %1461 = vmatpush.bf16.xpose.msra.mxu0 %v1452_v23 }
 0xa5e   : > { %2160 = vmatmul.msk.bf16.vlgmr.msra.gmra.mxu0 %vm821_vm5, %v1370_v9 }
 0xa6e   : > { %v1399_v24 = vpop.permute.xlu0 %1398 }
 0xa6f   : > { %v1404_v25 = vsel %vm821_vm5, %v1399_v24, 0 }
 0xa70   : > { %1413 = vmatpush.bf16.xpose.msrb.mxu2 %v1404_v25 }
 0xa76   : > { %v1423_v26 = vpop.permute.xlu0 %1422 }
 0xa77   : > { %v1428_v27 = vsel %vm821_vm5, %v1423_v26, 0  ;;  %2158 = vmatmul.msk.bf16.vlgmr.msrb.gmra.mxu2 %vm821_vm5, %v1368_v11 }
 0xa78   : > { %1437 = vmatpush.bf16.xpose.msrb.mxu3 %v1428_v27 }
 0xa7f   : > { %2159 = vmatmul.msk.bf16.vlgmr.msrb.gmra.mxu3 %vm821_vm5, %v1369_v16 }
 0xa82   : > { %v1391_v28 = vpop.f32.mrf.mxu1 }
 0xa83   : > { %v1392_v39 = vadd.f32 %v2949_v59, %v1391_v28 }
 0xa85   : > { %v1467_v43 = vsel %vm821_vm5, %v1392_v39, -inf }
 0xa8a   : > { %v1393_v29 = vpop.f32.mrf.mxu1 }
 0xadb   : > { %v1463_v32 = vpop.f32.mrf.mxu0 }
 0xadc   : > { %v1464_v33 = vadd.f32 %v2949_v59, %v1463_v32 }
 0xade   : > { %v1476_v31 = vsel %vm821_vm5, %v1464_v33, -inf }
 0xadf   : > { %1477 = vmax.xlane.f32.xlu1 %v1476_v31 }
 0xae3   : > { %v1465_v35 = vpop.f32.mrf.mxu0 }
 0xafa   : > { %v1415_v36 = vpop.f32.mrf.mxu2 }
 0xafb   : > { %v1416_v37 = vadd.f32 %v2949_v59, %v1415_v36 }
 0xafd   : > { %v1470_v38 = vsel %vm821_vm5, %v1416_v37, -inf }
 0xafe   : > { %1471 = vmax.xlane.f32.xlu0 %v1470_v38 }
 0xb02   : > { %v1417_v40 = vpop.f32.mrf.mxu2  ;;  %v1439_v34 = vpop.f32.mrf.mxu3 }
 0xb03   : > { %v1440_v41 = vadd.f32 %v2949_v59, %v1439_v34 }
 0xb05   : > { %v1473_v42 = vsel %vm821_vm5, %v1440_v41, -inf }
 0xb06   : > { %1474 = vmax.xlane.f32.xlu2 %v1473_v42  ;;  %1468 = vmax.xlane.f32.xlu0 %v1467_v43 }
 0xb0a   : > { %v1441_v44 = vpop.f32.mrf.mxu3 }
 0xb52   : > { %v1478_v45 = vpop.xlane.xlu1 %1477 }
 0xb53   : > { %v1482_v46 = vsub.f32 %v1464_v33, %v1478_v45 }
 0xb55   : > { %v1489_v47 = vmul.f32 1.442695, %v1482_v46 }
 0xb57   : > { %2412 = vpow2.f32 %v1489_v47 }
 0xb5d   : > { %v2413_v48 = vpop.eup %2412 }
 0xb5e   : > { %v1500_v49 = vsel %vm821_vm5, %v2413_v48, 0.0 }
 0xb5f   : > { %1501 = vadd.xlane.f32.xlu0 %v1500_v49 }
 0xb71   : > { %v1472_v51 = vpop.xlane.xlu0 %1471 }
 0xb72   : > { %v1480_v50 = vsub.f32 %v1416_v37, %v1472_v51 }
 0xb73   : > { %1630 = vrot.lane.b32.xlu0 %v1445_v15, %s2676_s24 }
 0xb74   : > { %v1485_v59 = vmul.f32 1.442695, %v1480_v50 }
 0xb76   : > { %2414 = vpow2.f32 %v1485_v59 }
 0xb79   : > { %v1475_v52 = vpop.xlane.xlu2 %1474  ;;  %v1469_v60 = vpop.xlane.xlu0 %1468 }
 0xb7a   : > { %v1481_v53 = vsub.f32 %v1440_v41, %v1475_v52  ;;  %v1479_v61 = vsub.f32 %v1392_v39, %v1469_v60 }
 0xb7b   : > { %1567 = vrot.lane.b32.xlu0 %v3061_v6, %s2676_s24 }
 0xb7c   : > { %v3091_v54 = vpop.eup %2414  ;;  %v1487_v55 = vmul.f32 1.442695, %v1481_v53  ;;  %v1483_v62 = vmul.f32 1.442695, %v1479_v61 }
 0xb7d   : > { %v1494_v56 = vsel %vm821_vm5, %v3091_v54, 0.0 }
 0xb7e   : > { %2416 = vpow2.f32 %v1487_v55  ;;  %1495 = vadd.xlane.f32.xlu2 %v1494_v56 }
 0xb7f   : > { %2418 = vpow2.f32 %v1483_v62 }
 0xb84   : > { %v3095_v57 = vpop.eup %2416 }
 0xb85   : > { %v1497_v58 = vsel %vm821_vm5, %v3095_v57, 0.0  ;;  %v3102_v63 = vpop.eup %2418 }
 0xb86   : > { %1498 = vadd.xlane.f32.xlu1 %v1497_v58  ;;  %v1491_v0 = vsel %vm821_vm5, %v3102_v63, 0.0 }
 0xb96   : > { %1588 = vrot.lane.b32.xlu2 %v3065_v17, %s2676_s24 }
 0xb9f   : > { %1609 = vrot.lane.b32.xlu1 %v1421_v21, %s2676_s24  ;;  %s3283_s24 = sld [smem:[#allocation32_spill]] }
 0xba5   : > { %s1958_s23 = scalar_lea.hbm %s3283_s24, %s2806_s2 }
 0xba6   : > { %s1962_s1 = sshll.u32 %s1958_s23, 4  ;;  %s1963_s1 = int_to_ptr.hbm [resolvable:$true] %s1962_s1 }
 0xba7   : > { %s2600_s26 = sshra.s32 %s1963_s1, 4  ;;  %s2601_s26 = int_to_ptr.hbm [resolvable:$true] %s2600_s26 }
 0xbbf   : > { %1492 = vadd.xlane.f32.xlu2 %v1491_v0 }
 0xbd2   : > { %v1502_v1 = vpop.xlane.xlu0 %1501 }
 0xbd3   : > { %2420 = vrcp.f32 %v1502_v1  ;;  %v1556_v5 = vand.u32 2147483648, %v1502_v1  ;;  %v1554_v7 = vand.u32 2147483647, %v1502_v1  ;;  %vm1550_vm7 = vweird.f32 %v1502_v1 }
 0xbd5   : > { %v1557_v10 = vor.u32 1.1754944e-38, %v1556_v5  ;;  %vm1555_vm9 = vcmp.eq.f32.partialorder %v1554_v7, 8.507059e+37 }
 0xbd9   : > { %v2421_v2 = vpop.eup %2420 }
 0xbda   : > { %v1546_v3 = vmul.f32 %v2421_v2, %v1502_v1  ;;  %vm1551_vm4 = vweird.f32 %v2421_v2 }
 0xbdb   : > { %vm1552_vm8 = vmor %vm1550_vm7, %vm1551_vm4 }
 0xbdc   : > { %v1547_v4 = vsub.f32 1.0, %v1546_v3 }
 0xbde   : > { %v1548_v6 = vmul.f32 %v2421_v2, %v1547_v4 }
 0xbe0   : > { %v1549_v9 = vadd.f32 %v2421_v2, %v1548_v6 }
 0xbe2   : > { %v1553_v11 = vsel %vm1552_vm8, %v2421_v2, %v1549_v9  ;;  %v2252_v9 = vld [vmem:[%s3223_s6 + $0x10] sm:$0xff] }
 0xbe3   : > { %v1558_v12 = vsel %vm1555_vm9, %v1557_v10, %v1553_v11 }
 0xbe4   : > { %v1562_v13 = vmul.f32 %v2413_v48, %v1558_v12 }
 0xbe5   : > { %v1631_v14 = vpop.permute.xlu0 %1630 }
 0xbe6   : > { %v1636_v15 = vsel %vm1018_vm6, %v1631_v14, 0  ;;  %v1566_v16 = vpack.c.bf16 %v1562_v13, %v1562_v13 }
 0xbe7   : > { %1645 = vmatpush.bf16.msrb.mxu0 %v1636_v15 }
 0xbea   : > { %2164 = vmatmul.msk.bf16.vlgmr.msrb.gmra.mxu0 %vm821_vm5, %v1566_v16 }
 0xbed   : > { %v1568_v17 = vpop.permute.xlu0 %1567 }
 0xbee   : > { %v1573_v18 = vsel %vm1018_vm6, %v1568_v17, 0  ;;  %v2379_v17 = vld [vmem:[%s3224_s7 + $0x1] ss:$0 sm:$0xff] }
 0xbef   : > { %1582 = vmatpush.bf16.msra.mxu1 %v1573_v18 }
 0xbf1   : > { %v1496_v19 = vpop.xlane.xlu2 %1495 }
 0xbf2   : > { %2422 = vrcp.f32 %v1496_v19  ;;  %v1528_v26 = vand.u32 2147483648, %v1496_v19  ;;  %v1526_v28 = vand.u32 2147483647, %v1496_v19  ;;  %vm1522_vm13 = vweird.f32 %v1496_v19 }
 0xbf4   : > { %v1529_v33 = vor.u32 1.1754944e-38, %v1528_v26  ;;  %vm1527_vm1 = vcmp.eq.f32.partialorder %v1526_v28, 8.507059e+37  ;;  %v2255_v28 = vld [vmem:[%s3227_s10 + $0x18] sm:$0xff] }
 0xbf8   : > { %v2423_v20 = vpop.eup %2422 }
 0xbf9   : > { %v1518_v21 = vmul.f32 %v2423_v20, %v1496_v19  ;;  %v1589_v22 = vpop.permute.xlu2 %1588  ;;  %v1499_v23 = vpop.xlane.xlu1 %1498  ;;  %vm1523_vm12 = vweird.f32 %v2423_v20 }
 0xbfa   : > { %v1594_v24 = vsel %vm1018_vm6, %v1589_v22, 0  ;;  %2424 = vrcp.f32 %v1499_v23  ;;  %vm1524_vm14 = vmor %vm1522_vm13, %vm1523_vm12  ;;  %v1542_v41 = vand.u32 2147483648, %v1499_v23  ;;  %vm1536_vm3 = vweird.f32 %v1499_v23 }
 0xbfb   : > { %v1519_v25 = vsub.f32 1.0, %v1518_v21  ;;  %1603 = vmatpush.bf16.msra.mxu2 %v1594_v24  ;;  %v1540_v42 = vand.u32 2147483647, %v1499_v23 }
 0xbfc   : > { %v1543_v44 = vor.u32 1.1754944e-38, %v1542_v41  ;;  %v2381_v41 = vld [vmem:[#allocation7 + $0x1] ss:$0 sm:$0xff] }
 0xbfd   : > { %v1520_v27 = vmul.f32 %v2423_v20, %v1519_v25  ;;  %vm1541_vm7 = vcmp.eq.f32.partialorder %v1540_v42, 8.507059e+37 }
 0xbff   : > { %v1521_v29 = vadd.f32 %v2423_v20, %v1520_v27  ;;  %1772 = vmatpush.bf16.msrb.mxu2 %v2255_v28 }
 0xc00   : > { %v2425_v32 = vpop.eup %2424 }
 0xc01   : > { %v1525_v31 = vsel %vm1524_vm14, %v2423_v20, %v1521_v29  ;;  %v1532_v35 = vmul.f32 %v2425_v32, %v1499_v23  ;;  %vm1537_vm2 = vweird.f32 %v2425_v32 }
 0xc02   : > { %v1530_v36 = vsel %vm1527_vm1, %v1529_v33, %v1525_v31  ;;  %vm1538_vm4 = vmor %vm1536_vm3, %vm1537_vm2  ;;  %vm1947_vm1 = vcmask 49152  }
 0xc03   : > { %v1560_v37 = vmul.f32 %v3091_v54, %v1530_v36  ;;  %v1533_v38 = vsub.f32 1.0, %v1532_v35 }
 0xc05   : > { %v1534_v39 = vmul.f32 %v2425_v32, %v1533_v38  ;;  %v1564_v40 = vpack.c.bf16 %v1560_v37, %v1560_v37 }
 0xc07   : > { %v1535_v34 = vadd.f32 %v2425_v32, %v1534_v39  ;;  %2162 = vmatmul.msk.bf16.vlgmr.msra.gmra.mxu2 %vm821_vm5, %v1564_v40  ;;  %v2380_v40 = vld [vmem:[#allocation5 + $0x1] ss:$0 sm:$0xff] }
 0xc09   : > { %v1539_v43 = vsel %vm1538_vm4, %v2425_v32, %v1535_v34 }
 0xc0a   : > { %v1544_v45 = vsel %vm1541_vm7, %v1543_v44, %v1539_v43 }
 0xc0b   : > { %v1561_v46 = vmul.f32 %v3095_v57, %v1544_v45 }
 0xc0d   : > { %v1565_v49 = vpack.c.bf16 %v1561_v46, %v1561_v46  ;;  %v2259_v46 = vld [vmem:[%s3229_s12 + $0x38] sm:$0xff] }
 0xc11   : > { %v1610_v47 = vpop.permute.xlu1 %1609 }
 0xc12   : > { %v1615_v48 = vsel %vm1018_vm6, %v1610_v47, 0  ;;  %v2258_v47 = vld [vmem:[%s3229_s12 + $0x30] sm:$0xff] }
 0xc13   : > { %1624 = vmatpush.bf16.msra.mxu3 %v1615_v48  ;;  %v2257_v48 = vld [vmem:[%s3229_s12 + $0x28] sm:$0xff] }
 0xc16   : > { %2163 = vmatmul.msk.bf16.vlgmr.msra.gmra.mxu3 %vm821_vm5, %v1565_v49  ;;  %v2256_v49 = vld [vmem:[%s3229_s12 + $0x20] sm:$0xff] }
 0xc17   : > { %1834 = vmatpush.bf16.msrb.mxu3 %v2259_v46 }
 0xc1b   : > { %1835 = vmatpush.bf16.msrb.mxu3 %v2258_v47 }
 0xc1f   : > { %1836 = vmatpush.bf16.msrb.mxu3 %v2257_v48 }
 0xc23   : > { %1837 = vmatpush.bf16.msrb.mxu3 %v2256_v49 }
 0xc32   : > { %v1493_v51 = vpop.xlane.xlu2 %1492 }
 0xc33   : > { %2426 = vrcp.f32 %v1493_v51  ;;  %v1514_v53 = vand.u32 2147483648, %v1493_v51  ;;  %v1512_v55 = vand.u32 2147483647, %v1493_v51  ;;  %vm1508_vm9 = vweird.f32 %v1493_v51 }
 0xc35   : > { %v1515_v57 = vor.u32 1.1754944e-38, %v1514_v53  ;;  %vm1513_vm13 = vcmp.eq.f32.partialorder %v1512_v55, 8.507059e+37 }
 0xc39   : > { %v2427_v50 = vpop.eup %2426 }
 0xc3a   : > { %v1504_v59 = vmul.f32 %v2427_v50, %v1493_v51  ;;  %vm1509_vm8 = vweird.f32 %v2427_v50  ;;  %v2382_v51 = vld [vmem:[%s3228_s11 + $0x1] ss:$0 sm:$0xff] }
 0xc3b   : > { %vm1510_vm12 = vmor %vm1508_vm9, %vm1509_vm8 }
 0xc3c   : > { %v1505_v52 = vsub.f32 1.0, %v1504_v59 }
 0xc3e   : > { %v1506_v54 = vmul.f32 %v2427_v50, %v1505_v52 }
 0xc40   : > { %v1507_v56 = vadd.f32 %v2427_v50, %v1506_v54 }
 0xc42   : > { %v1511_v58 = vsel %vm1510_vm12, %v2427_v50, %v1507_v56 }
 0xc43   : > { %v1516_v60 = vsel %vm1513_vm13, %v1515_v57, %v1511_v58 }
 0xc44   : > { %v1559_v61 = vmul.f32 %v3102_v63, %v1516_v60  ;;  %v2253_v63 = vld [vmem:[%s3223_s6 + $0x18] sm:$0xff] }
 0xc45   : > { %1698 = vmatpush.bf16.msrb.mxu1 %v2253_v63 }
 0xc46   : > { %v1563_v62 = vpack.c.bf16 %v1559_v61, %v1559_v61 }
 0xc48   : > { %2161 = vmatmul.msk.bf16.vlgmr.msra.gmra.mxu1 %vm821_vm5, %v1563_v62 }
 0xc49   : > { %1699 = vmatpush.bf16.msrb.mxu1 %v2252_v9 }
 0xc67   : > { %v1647_v0 = vpop.f32.mrf.mxu0 }
 0xc6f   : > { %v1649_v1 = vpop.f32.mrf.mxu0 }
 0xc70   : > { %v2383_v1 = vld [vmem:[%s3230_s13 + $0x1] ss:$0 sm:$0xff] }
 0xc8a   : > { %v1605_v2 = vpop.f32.mrf.mxu2 }
 0xc8b   : > { %1652 = vrot.lane.b32.xlu1 %v1605_v2, %s2677_s15  ;;  %s3284_s15 = smov %s3283_s24 }
 0xc8c   : > { %s2606_s21 = scalar_lea.hbm %s3284_s15, 2  ;;  %p2607_p3 = scmp.lt.s32.totalorder %s2601_s26, %s3284_s15 }
 0xc92   : > { %v1607_v3 = vpop.f32.mrf.mxu2 }
 0xc93   : > { %1660 = vrot.lane.b32.xlu1 %v1647_v0, %s3280_s28  ;;  %s3282_s28 = sld [smem:[#allocation30_spill]] }
 0xc99   : > { %v1626_v4 = vpop.f32.mrf.mxu3 }
 0xc9a   : > { %1656 = vrot.lane.b32.xlu0 %v1626_v4, %s3281_s30  ;;  %s710_s30 = sand.u32 1, %s2652_s22  }
 0xc9b   : > { %s711_s20 = scalar_lea.vmem [#allocation11], %s710_s30  ;;  %s1950_s27 = scalar_lea.sflag [#allocation4], %s710_s30 }
 0xc9c   : > { %s1960_s25 = sshll.u32 %s711_s20, 4  ;;  %s1961_s25 = int_to_ptr.vmem [resolvable:$true] %s1960_s25 }
 0xca1   : > { %v1628_v5 = vpop.f32.mrf.mxu3 }
 0xcc5   : > { %v1584_v6 = vpop.f32.mrf.mxu1 }
 0xccd   : > { %v1586_v7 = vpop.f32.mrf.mxu1 }
 0xcfd   : > { %v1653_v10 = vpop.permute.xlu1 %1652 }
 0xcfe   : > { %v1663_v11 = vsel %vm821_vm5, %v1584_v6, %v1653_v10 }
 0xd05   : > { %v1661_v13 = vpop.permute.xlu1 %1660 }
 0xd0c   : > { %v1657_v12 = vpop.permute.xlu0 %1656 }
 0xd0d   : > { %v1664_v14 = vsel %vm1111_vm10, %v1663_v11, %v1657_v12  ;;  %v2261_v12 = vld [vmem:[#allocation10 + $0x8] sm:$0xff] }
 0xd0e   : > { %v1665_v15 = vsel %vm1113_vm11, %v1664_v14, %v1661_v13  ;;  %1905 = vmatpush.bf16.msra.mxu0 %v2261_v12  ;;  %v2260_v13 = vld [vmem:[#allocation10] sm:$0xff] }
 0xd0f   : > { %v1666_v16 = vpack.c.bf16 %v1665_v15, %v1665_v15 }
 0xd11   : > { %2178 = vmatmul.msk.bf16.vlgmr.msrb.gmra.mxu1 %vm724_vm0, %v1666_v16 }
 0xd12   : > { %1906 = vmatpush.bf16.msra.mxu0 %v2260_v13 }
 0xd8e   : > { %v1701_v18 = vpop.f32.mrf.mxu1 }
 0xd8f   : > { %v1702_v19 = vadd.f32 %v2379_v17, %v1701_v18 }
 0xd91   : > { %v1705_v20 = vadd.f32 %v1702_v19, %v3050_v30  ;;  %v2254_v30 = vld [vmem:[%s3227_s10 + $0x10] sm:$0xff] }
 0xd92   : > { %1773 = vmatpush.bf16.msrb.mxu2 %v2254_v30  ;;  %v2263_v30 = vld [vmem:[%s3235_s18 + $0x8] sm:$0xff] }
 0xd93   : > { %v1710_v21 = vsel %vm724_vm0, %v1705_v20, 0.0  ;;  %1940 = vmatpush.bf16.msra.mxu1 %v2263_v30 }
 0xd94   : > { %1711 = vadd.xlane.f32.xlu0 %v1710_v21 }
 0xd96   : > { %v1703_v22 = vpop.f32.mrf.mxu1 }
 0xe07   : > { %v1712_v23 = vpop.xlane.xlu0 %1711 }
 0xe08   : > { %v1713_v24 = vmul.f32 %v1712_v23, %v2898_v8  ;;  %v2384_v23 = vld [vmem:[%s3231_s14 + $0x1] ss:$0 sm:$0xff] }
 0xe0a   : > { %v1714_v25 = vsub.f32 %v1705_v20, %v1713_v24 }
 0xe0c   : > { %v1715_v26 = vmul.f32 %v1714_v25, %v1714_v25 }
 0xe0e   : > { %v1716_v27 = vsel %vm724_vm0, %v1715_v26, 0.0  ;;  %v2385_v26 = vld [vmem:[#allocation8 + $0x1] ss:$0 sm:$0xff] }
 0xe0f   : > { %1717 = vadd.xlane.f32.xlu1 %v1716_v27 }
 0xe82   : > { %v1718_v29 = vpop.xlane.xlu1 %1717 }
 0xe83   : > { %v1719_v32 = vmul.f32 %v1718_v29, %v2898_v8  ;;  %v2262_v29 = vld [vmem:[%s3235_s18] sm:$0xff] }
 0xe84   : > { %1941 = vmatpush.bf16.msra.mxu1 %v2262_v29 }
 0xe85   : > { %v1720_v33 = vadd.f32 1e-12, %v1719_v32  ;;  %v1883_v32 = vld [vmem:[%s3282_s28] sm:$0x1]  ;;  %s2602_s28 = scalar_lea.hbm %s2601_s26, 1 }
 0xe86   : > { %p2603_p0 = scmp.ne.s32.totalorder %s2601_s26, %s2602_s28  ;;  %p2608_p4 = scmp.lt.s32.totalorder %s2606_s21, %s2602_s28 }
 0xe87   : > { %2428 = vrsqrt.f32 %v1720_v33  ;;  %vm1727_vm6 = vweird.f32 %v1720_v33 }
 0xe88   : > { %p2604_p1 = pnand %p2603_p0, %p2823_p5  ;;  %p2609_p7 = por %p2608_p4, %p2607_p3 }
 0xe8a   : > { %p2605_p2 = pneg %p2604_p1 }
 0xe8c   : > { %p2610_p8 = pnand %p2609_p7, %p2605_p2 }
 0xe8d   : > { %v2429_v31 = vpop.eup %2428 }
 0xe8e   : > { %v1722_v35 = vmul.f32 %v2429_v31, %v1720_v33  ;;  %vm1728_vm5 = vweird.f32 %v2429_v31 }
 0xe8f   : > { %vm1729_vm10 = vmor %vm1727_vm6, %vm1728_vm5 }
 0xe90   : > { %v1723_v36 = vmul.f32 %v2429_v31, %v1722_v35 }
 0xe92   : > { %v1724_v37 = vmul.f32 0.5, %v1723_v36 }
 0xe94   : > { %v1725_v38 = vsub.f32 1.5, %v1724_v37 }
 0xe96   : > { %v1726_v39 = vmul.f32 %v2429_v31, %v1725_v38  ;;  %v1918_v38 = vld [vmem:[%s3285_s17] sm:$0x1] }
 0xe98   : > { %v1730_v34 = vsel %vm1729_vm10, %v2429_v31, %v1726_v39 }
 0xe99   : > { %v1731_v42 = vmul.f32 %v1730_v34, %v1714_v25 }
 0xe9b   : > { %v1735_v43 = vmul.f32 %v2380_v40, %v1731_v42 }
 0xe9d   : > { %v1739_v44 = vadd.f32 %v2381_v41, %v1735_v43 }
 0xe9f   : > { %v1740_v45 = vpack.c.bf16 %v1739_v44, %v1739_v44 }
 0xea1   : > { %2192 = vmatmul.msk.bf16.vlgmr.msrb.gmra.mxu2 %vm724_vm0, %v1740_v45 }
 0xf24   : > { %v1775_v50 = vpop.f32.mrf.mxu2 }
 0xf25   : > { %v1776_v59 = vadd.f32 %v2382_v51, %v1775_v50 }
 0xf27   : > { %v1780_v52 = vmul.f32 0.044715, %v1776_v59  ;;  %v1779_v60 = vmul.f32 0.5, %v1776_v59 }
 0xf29   : > { %v1781_v53 = vmul.f32 %v1780_v52, %v1776_v59 }
 0xf2b   : > { %v1782_v54 = vmul.f32 %v1781_v53, %v1776_v59 }
 0xf2c   : > { %v1777_v55 = vpop.f32.mrf.mxu2 }
 0xf2d   : > { %v1783_v56 = vadd.f32 %v1782_v54, %v1776_v59 }
 0xf2f   : > { %v1784_v57 = vmul.f32 0.7978846, %v1783_v56 }
 0xf31   : > { %2430 = vtanh.f32 %v1784_v57 }
 0xf37   : > { %v2431_v58 = vpop.eup %2430 }
 0xf38   : > { %v1786_v61 = vadd.f32 1.0, %v2431_v58 }
 0xf3a   : > { %v1787_v62 = vmul.f32 %v1786_v61, %v1779_v60 }
 0xf3c   : > { %v1788_v0 = vpack.c.bf16 %v1787_v62, %v1787_v62 }
 0xf3e   : > { %2218 = vmatmul.msk.bf16.vlgmr.msrb.gmra.mxu3 %vm1268_vm15, %v1788_v0 }
 0xfc1   : > { %v1839_v2 = vpop.f32.mrf.mxu3 }
 0xfc2   : > { %v1840_v3 = vadd.f32 %v2383_v1, %v1839_v2 }
 0xfc4   : > { %v1843_v4 = vadd.f32 %v1840_v3, %v1739_v44 }
 0xfc6   : > { %v1848_v5 = vsel %vm724_vm0, %v1843_v4, 0.0 }
 0xfc7   : > { %1849 = vadd.xlane.f32.xlu2 %v1848_v5 }
 0xfc9   : > { %v1841_v6 = vpop.f32.mrf.mxu3 }
0x103a   : > { %v1850_v7 = vpop.xlane.xlu2 %1849 }
0x103b   : > { %v1851_v63 = vmul.f32 %v1850_v7, %v2898_v8 }
0x103d   : > { %v1852_v9 = vsub.f32 %v1843_v4, %v1851_v63 }
0x103f   : > { %v1853_v10 = vmul.f32 %v1852_v9, %v1852_v9 }
0x1041   : > { %v1854_v11 = vsel %vm724_vm0, %v1853_v10, 0.0 }
0x1042   : > { %1855 = vadd.xlane.f32.xlu2 %v1854_v11 }
0x10b5   : > { %v1856_v14 = vpop.xlane.xlu2 %1855 }
0x10b6   : > { %v1857_v15 = vmul.f32 %v1856_v14, %v2898_v8 }
0x10b8   : > { %v1858_v16 = vadd.f32 1e-12, %v1857_v15 }
0x10ba   : > { %2432 = vrsqrt.f32 %v1858_v16  ;;  %vm1865_vm15 = vweird.f32 %v1858_v16 }
0x10c0   : > { %v2433_v17 = vpop.eup %2432 }
0x10c1   : > { %v1860_v18 = vmul.f32 %v2433_v17, %v1858_v16  ;;  %vm1866_vm11 = vweird.f32 %v2433_v17 }
0x10c2   : > { %vm1867_vm14 = vmor %vm1865_vm15, %vm1866_vm11 }
0x10c3   : > { %v1861_v19 = vmul.f32 %v2433_v17, %v1860_v18 }
0x10c5   : > { %v1862_v20 = vmul.f32 0.5, %v1861_v19 }
0x10c7   : > { %v1863_v21 = vsub.f32 1.5, %v1862_v20 }
0x10c9   : > { %v1864_v22 = vmul.f32 %v2433_v17, %v1863_v21 }
0x10cb   : > { %v1868_v24 = vsel %vm1867_vm14, %v2433_v17, %v1864_v22 }
0x10cc   : > { %v1869_v25 = vmul.f32 %v1868_v24, %v1852_v9 }
0x10ce   : > { %v1873_v27 = vmul.f32 %v2384_v23, %v1869_v25 }
0x10d0   : > { %v1877_v8 = vadd.f32 %v2385_v26, %v1873_v27 }
0x10d2   : > { %v1878_v28 = vpack.c.bf16 %v1877_v8, %v1877_v8 }
0x10d4   : > { %2228 = vmatmul.msk.bf16.vlgmr.msra.gmra.mxu0 %vm724_vm0, %v1878_v28 }
0x1151   : > { %v1908_v33 = vpop.f32.mrf.mxu0 }
0x1152   : > { %v1909_v31 = vadd.f32 %v1908_v33, %v1883_v32 }
0x1154   : > { %2434 = vtanh.f32 %v1909_v31 }
0x1159   : > { %v1910_v35 = vpop.f32.mrf.mxu0 }
0x115a   : > { %v2435_v36 = vpop.eup %2434 }
0x115b   : > { %v1913_v37 = vpack.c.bf16 %v2435_v36, %v2435_v36 }
0x115d   : > { %2237 = vmatmul.msk.bf16.vlgmr.msra.gmra.mxu1 %vm724_vm0, %v1913_v37 }
0x11da   : > { %v1943_v39 = vpop.f32.mrf.mxu1 }
0x11db   : > { %v1944_v40 = vadd.f32 %v1943_v39, %v1918_v38 }
0x11dd   : > { %1948 = vst.msk [vmem:[%s711_s20] sm:$0x1] %vm1947_vm1, %v1944_v40 }
0x11de   : > { %2613 = shalt.err (!%p2610_p8)
}
0x11df   : > { %2284 = dma.vmem_to_hbm [thread:$0]  (%p2823_p5), %s1961_s25, 16, %s1963_s1, %s1950_s27  }
0x11e2   : > { %v1945_v34 = vpop.f32.mrf.mxu1 }
0x11e3 PF: > { %s3287_s30 = sld [smem:[#allocation18_spill]] }
0x11e4   : > { %s3288_s8 = sld [smem:[#allocation16_spill]] }
0x11e9   : > { %p2316_p9 = scmp.ge.s32.totalorder %s3287_s30, 2 }
0x11ea   : > { %s1974_s17 = sand.u32 1, %s3288_s8  }
0x11eb   : > { %p2303_p10 = pnand %p2316_p9, %p2827_p6  ;;  %s1975_s20 = scalar_lea.sflag [#allocation4], %s1974_s17 }
0x11ed   : > { %p2304_p11 = pneg %p2303_p10 }
0x11ef   : > { %2643 = dma.done.wait (%p2304_p11), %s1975_s20, 16  }
0x11f0   : > { %2645 = vsyncadd (%p2304_p11), %s1975_s20, 4294967280  ;;  %s3290_s24 = sld [smem:[#allocation19_spill]]  ;;  %s3293_s1 = smov %s2652_s22 }
0x11f1   : > { %s3291_s26 = sld [smem:[#allocation17_spill]] }
0x11f2   : > { %s3292_s23 = sld [smem:[#allocation20_spill]] }
0x11f6   : > { %p33_p12 = scmp.ge.s32.totalorder %s3290_s24, 4  }
0x11f7   : > { %s3294_s22 = smov %s3291_s26 }
0x11f8   :  { %35 = sbr.rel (!%p33_p12) target bundleno = 17 (0x11), region = 171 }
0x11fd   :  { %1980 = vsyncpa [#allocation3], 1 }
0x11fe   :  { %1982 = vsyncpa [#allocation3 + $0x1], 1 }
0x11ff   :  { %1983 = vsyncpa [#allocation6], 1 }
0x1200   :  { %1984 = vsyncpa [#allocation9], 1 }
0x1201   :  { %1985 = vsyncpa [#allocation4], 1 }
0x1202   :  { %1987 = vsyncpa [#allocation4 + $0x1], 1 }

</bundles_post_ra>
